<compile_context>
chip_gen: v5e
topology: v5e:2x2
jax: 0.10.0
libtpu: 0.0.40
codegen_flags: <defaults>
</compile_context>

<pallas_src>
import jax
import jax.numpy as jnp
from jax import lax
from jax.experimental import pallas as pl
from jax.experimental.pallas import tpu as pltpu


def _birnn_kernel(x_f_ref,    # (Tt, Bp, I)   forward-time x block
                  x_b_ref,    # (Tt, Bp, I)   reversed-index x block (backward stream)
                  wih_f_ref,  # (I, Hp)       forward  W_ih^T (zero-padded)
                  b_f_ref,    # (1, Hp)       forward  b_ih + b_hh
                  wih_b_ref,  # (I, Hp)       backward W_ih^T
                  b_b_ref,    # (1, Hp)       backward b_ih + b_hh
                  whh_ref,    # (2Hp, 2Hp)    block-diag [[Whh_f^T, 0], [0, Whh_b^T]]
                  h0_ref,     # (2, Bp, Hp)   initial hidden (fwd, bwd)
                  out_ref,    # (2, Bp, Hp)   final hidden (fwd, bwd)
                  proj_f,     # VMEM (Tt, Bp, Hp)  precomputed fwd input projection
                  proj_b,     # VMEM (Tt, Bp, Hp)  precomputed bwd input projection
                  h_scr):     # VMEM (Bp, 2Hp)     fused carry across grid steps
    Tt, Bp, I = x_f_ref.shape
    Hp = wih_f_ref.shape[1]

    # Initialize the fused carry [h_fwd | h_bwd] on the first time tile.
    @pl.when(pl.program_id(0) == 0)
    def _():
        h_scr[...] = jnp.concatenate([h0_ref[0], h0_ref[1]], axis=-1)

    # --- Tile prologue: hoisted input projection (bias folded), both directions.
    # One (Tt*Bp, I) @ (I, Hp) matmul per direction -- off the serial chain.
    xf = x_f_ref[...].reshape(Tt * Bp, I)
    xb = x_b_ref[...].reshape(Tt * Bp, I)
    proj_f[...] = (jnp.dot(xf, wih_f_ref[...], preferred_element_type=jnp.float32)
                   + b_f_ref[...]).reshape(Tt, Bp, Hp)
    proj_b[...] = (jnp.dot(xb, wih_b_ref[...], preferred_element_type=jnp.float32)
                   + b_b_ref[...]).reshape(Tt, Bp, Hp)

    # --- Serial recurrence: one fused (Bp, 2Hp) @ (2Hp, 2Hp) matmul per timestep.
    def step(s, h):
        # fwd consumes local time s; bwd consumes the reversed local time of its
        # (already reverse-indexed) block -> global time T-1-(global step).
        xin = jnp.concatenate([proj_f[s], proj_b[Tt - 1 - s]], axis=-1)
        rec = jnp.dot(h, whh_ref[...], preferred_element_type=jnp.float32)
        return jnp.tanh(xin + rec)

    h_fin = lax.fori_loop(0, Tt, step, h_scr[...], unroll=min(Tt, 8))
    h_scr[...] = h_fin

    @pl.when(pl.program_id(0) == pl.num_programs(0) - 1)
    def _():
        out_ref[0] = h_fin[:, :Hp]
        out_ref[1] = h_fin[:, Hp:]


def conversation_rnn_forward(input_, params, hx=None, max_t_tile=256):
    """Pallas implementation of ConversationRNN.forward -> hidden (2, B, H)."""
    B, T, I = input_.shape
    H = params["w_hh_f"].shape[0]
    Hp = pl.cdiv(H, 128) * 128           # lane-pad hidden size
    Bp = pl.cdiv(B, 8) * 8               # sublane-pad batch
    f32 = jnp.float32

    if hx is None:
        hx = jnp.zeros((2, B, H), f32)

    # Largest time tile that divides T (worst case 1); keeps fwd/bwd block
    # bookkeeping exact without masking.  Scratch stays small (<~2.1 MiB for
    # tile=256), well under the v7x 64 MiB VMEM budget.
    t_tile = 1
    for d in range(min(T, max_t_tile), 0, -1):
        if T % d == 0:
            t_tile = d
            break
    nt = T // t_tile

    def pad2(w, rows, cols):
        r, c = w.shape
        return jnp.pad(w.astype(f32), ((0, rows - r), (0, cols - c)))

    # Time-major, batch-padded x.  x is the *small* tensor (T*B*I); the large
    # projected (T, B, Hp) tensor is produced on-chip in VMEM only.
    x_tm = jnp.transpose(input_.astype(f32), (1, 0, 2))
    x_tm = jnp.pad(x_tm, ((0, 0), (0, Bp - B), (0, 0)))                  # (T, Bp, I)

    wih_f = pad2(params["w_ih_f"].T, I, Hp)                              # (I, Hp)
    wih_b = pad2(params["w_ih_b"].T, I, Hp)
    b_f = jnp.pad((params["b_ih_f"] + params["b_hh_f"]).astype(f32),
                  (0, Hp - H)).reshape(1, Hp)
    b_b = jnp.pad((params["b_ih_b"] + params["b_hh_b"]).astype(f32),
                  (0, Hp - H)).reshape(1, Hp)
    whh_f_t = pad2(params["w_hh_f"].T, Hp, Hp)
    whh_b_t = pad2(params["w_hh_b"].T, Hp, Hp)
    z = jnp.zeros((Hp, Hp), f32)
    whh_bd = jnp.block([[whh_f_t, z], [z, whh_b_t]])                     # (2Hp, 2Hp)
    h0_p = jnp.pad(hx.astype(f32), ((0, 0), (0, Bp - B), (0, Hp - H)))   # (2, Bp, Hp)

    grid_spec = pltpu.PrefetchScalarGridSpec(
        num_scalar_prefetch=0,
        grid=(nt,),
        in_specs=[
            # forward-time x stream
            pl.BlockSpec((t_tile, Bp, I), lambda t: (t, 0, 0)),
            # backward-time x stream: same array, reversed block index
            pl.BlockSpec((t_tile, Bp, I), lambda t: (nt - 1 - t, 0, 0)),
            pl.BlockSpec((I, Hp), lambda t: (0, 0)),
            pl.BlockSpec((1, Hp), lambda t: (0, 0)),
            pl.BlockSpec((I, Hp), lambda t: (0, 0)),
            pl.BlockSpec((1, Hp), lambda t: (0, 0)),
            pl.BlockSpec((2 * Hp, 2 * Hp), lambda t: (0, 0)),
            pl.BlockSpec((2, Bp, Hp), lambda t: (0, 0, 0)),
        ],
        out_specs=pl.BlockSpec((2, Bp, Hp), lambda t: (0, 0, 0)),
        scratch_shapes=[pltpu.VMEM((t_tile, Bp, Hp), f32),
                        pltpu.VMEM((t_tile, Bp, Hp), f32),
                        pltpu.VMEM((Bp, 2 * Hp), f32)],
    )

    hidden_p = pl.pallas_call(
        _birnn_kernel,
        out_shape=jax.ShapeDtypeStruct((2, Bp, Hp), f32),
        grid_spec=grid_spec,
        compiler_params=pltpu.CompilerParams(
            dimension_semantics=("arbitrary",)),
    )(x_tm, x_tm, wih_f, b_f, wih_b, b_b, whh_bd, h0_p)

    return hidden_p[:, :B, :H]


def init_params(key, input_size, hidden_size):
    """Deterministic init mirroring nn.RNN's U(-1/sqrt(H), 1/sqrt(H))."""
    k = 1.0 / jnp.sqrt(jnp.float32(hidden_size))
    names_shapes = [
        ("w_ih_f", (hidden_size, input_size)),
        ("w_hh_f", (hidden_size, hidden_size)),
        ("b_ih_f", (hidden_size,)),
        ("b_hh_f", (hidden_size,)),
        ("w_ih_b", (hidden_size, input_size)),
        ("w_hh_b", (hidden_size, hidden_size)),
        ("b_ih_b", (hidden_size,)),
        ("b_hh_b", (hidden_size,)),
    ]
    keys = jax.random.split(key, len(names_shapes))
    return {name: jax.random.uniform(kk, shape, jnp.float32, -k, k)
            for kk, (name, shape) in zip(keys, names_shapes)}


def conversation_rnn_ref(input_, params, hx=None):
    """Pure-JAX reference (semantics of torch.nn.RNN, bidirectional, tanh)."""
    B, T, I = input_.shape
    H = params["w_hh_f"].shape[0]
    if hx is None:
        hx = jnp.zeros((2, B, H), jnp.float32)
    hf, hb = hx[0], hx[1]
    hi = lax.Precision.HIGHEST
    for t in range(T):
        hf = jnp.tanh(jnp.dot(input_[:, t], params["w_ih_f"].T, precision=hi)
                      + params["b_ih_f"]
                      + jnp.dot(hf, params["w_hh_f"].T, precision=hi)
                      + params["b_hh_f"])
    for t in range(T - 1, -1, -1):
        hb = jnp.tanh(jnp.dot(input_[:, t], params["w_ih_b"].T, precision=hi)
                      + params["b_ih_b"]
                      + jnp.dot(hb, params["w_hh_b"].T, precision=hi)
                      + params["b_hh_b"])
    return jnp.stack([hf, hb], axis=0)


if __name__ == "__main__":
    # Small shapes consistent with the module: batch=2, seq=8, input_size=1, hidden=32.
    B, T, I, H = 2, 8, 1, 32
    key = jax.random.PRNGKey(0)
    k_x, k_p = jax.random.split(key)
    x = jax.random.normal(k_x, (B, T, I), jnp.float32)
    params = init_params(k_p, I, H)

    hidden = conversation_rnn_forward(x, params, hx=None)   # hx=None -> zeros, as in nn.RNN
    hidden = jax.block_until_ready(hidden)

    ref = jax.block_until_ready(conversation_rnn_ref(x, params))
    assert hidden.shape == (2, B, H), hidden.shape
    assert jnp.allclose(hidden, ref, rtol=2e-3, atol=2e-3), (
        float(jnp.max(jnp.abs(hidden - ref))))
    print("KERNEL_OK")
</pallas_src>

<mosaic_0001>
module attributes {stable_mosaic.version = 11 : i64} {
  func.func @_birnn_kernel(%arg0: i32, %arg1: memref<8x8x1xf32, #tpu.memory_space<vmem>>, %arg2: memref<8x8x1xf32, #tpu.memory_space<vmem>>, %arg3: memref<1x128xf32, #tpu.memory_space<vmem>>, %arg4: memref<1x128xf32, #tpu.memory_space<vmem>>, %arg5: memref<1x128xf32, #tpu.memory_space<vmem>>, %arg6: memref<1x128xf32, #tpu.memory_space<vmem>>, %arg7: memref<256x256xf32, #tpu.memory_space<vmem>>, %arg8: memref<2x8x128xf32, #tpu.memory_space<vmem>>, %arg9: memref<2x8x128xf32, #tpu.memory_space<vmem>>, %arg10: memref<8x8x128xf32, #tpu.memory_space<vmem>>, %arg11: memref<8x8x128xf32, #tpu.memory_space<vmem>>, %arg12: memref<8x256xf32, #tpu.memory_space<vmem>>) attributes {dimension_semantics = [#tpu.dimension_semantics<arbitrary>], iteration_bounds = array<i64: 1>, scalar_prefetch = 0 : i64, scratch_operands = 3 : i64, tpu.core_type = #tpu.core_type<tc>, window_params = [{transform_indices = @transform_0, window_bounds = array<i64: 8, 8, 1>}, {transform_indices = @transform_1, window_bounds = array<i64: 8, 8, 1>}, {pipeline_mode = #tpu.pipeline_mode<synchronous>, transform_indices = @transform_2, window_bounds = array<i64: 1, 128>}, {pipeline_mode = #tpu.pipeline_mode<synchronous>, transform_indices = @transform_3, window_bounds = array<i64: 1, 128>}, {pipeline_mode = #tpu.pipeline_mode<synchronous>, transform_indices = @transform_4, window_bounds = array<i64: 1, 128>}, {pipeline_mode = #tpu.pipeline_mode<synchronous>, transform_indices = @transform_5, window_bounds = array<i64: 1, 128>}, {pipeline_mode = #tpu.pipeline_mode<synchronous>, transform_indices = @transform_6, window_bounds = array<i64: 256, 256>}, {pipeline_mode = #tpu.pipeline_mode<synchronous>, transform_indices = @transform_7, window_bounds = array<i64: 2, 8, 128>}, {pipeline_mode = #tpu.pipeline_mode<synchronous>, transform_indices = @transform_8, window_bounds = array<i64: 2, 8, 128>}]} {
    %c0_i32 = arith.constant 0 : i32
    %0 = arith.cmpi eq, %arg0, %c0_i32 : i32
    %1 = arith.extui %0 : i1 to i32
    %c0_i32_0 = arith.constant 0 : i32
    %2 = arith.cmpi ne, %1, %c0_i32_0 : i32
    scf.if %2 {
      %c0_92 = arith.constant 0 : index
      %c0_93 = arith.constant 0 : index
      %c0_94 = arith.constant 0 : index
      %122 = vector.load %arg8[%c0_92, %c0_93, %c0_94] : memref<2x8x128xf32, #tpu.memory_space<vmem>>, vector<1x8x128xf32>
      %123 = vector.shape_cast %122 : vector<1x8x128xf32> to vector<8x128xf32>
      %c1 = arith.constant 1 : index
      %c0_95 = arith.constant 0 : index
      %c0_96 = arith.constant 0 : index
      %124 = vector.load %arg8[%c1, %c0_95, %c0_96] : memref<2x8x128xf32, #tpu.memory_space<vmem>>, vector<1x8x128xf32>
      %125 = vector.shape_cast %124 : vector<1x8x128xf32> to vector<8x128xf32>
      %126 = tpu.concatenate %123, %125 in 1 : vector<8x128xf32>, vector<8x128xf32> -> vector<8x256xf32>
      %c0_97 = arith.constant 0 : index
      %c0_98 = arith.constant 0 : index
      %127 = vector.load %arg12[%c0_97, %c0_98] : memref<8x256xf32, #tpu.memory_space<vmem>>, vector<8x256xf32>
      tpu.vector_store %arg12[%c0_97, %c0_98], %126 {strides = array<i32>} : memref<8x256xf32, #tpu.memory_space<vmem>>, vector<8x256xf32>,
    } else {
    }
    %c0 = arith.constant 0 : index
    %c0_1 = arith.constant 0 : index
    %c0_2 = arith.constant 0 : index
    %3 = vector.load %arg1[%c0, %c0_1, %c0_2] : memref<8x8x1xf32, #tpu.memory_space<vmem>>, vector<8x8x1xf32>
    %4 = vector.shape_cast %3 : vector<8x8x1xf32> to vector<64x1xf32>
    %c0_3 = arith.constant 0 : index
    %c0_4 = arith.constant 0 : index
    %c0_5 = arith.constant 0 : index
    %5 = vector.load %arg2[%c0_3, %c0_4, %c0_5] : memref<8x8x1xf32, #tpu.memory_space<vmem>>, vector<8x8x1xf32>
    %6 = vector.shape_cast %5 : vector<8x8x1xf32> to vector<64x1xf32>
    %c0_6 = arith.constant 0 : index
    %c0_7 = arith.constant 0 : index
    %7 = vector.load %arg3[%c0_6, %c0_7] : memref<1x128xf32, #tpu.memory_space<vmem>>, vector<1x128xf32>
    %cst = arith.constant dense<0.000000e+00> : vector<64x128xf32>
    %8 = tpu.matmul %4, %7, %cst {dimension_numbers = #tpu.dot_dimension_numbers<[1], [0], [0], [1], [0, 0, 1, 1], [], []>} : vector<64x1xf32>, vector<1x128xf32>, vector<64x128xf32> -> vector<64x128xf32>
    %c0_8 = arith.constant 0 : index
    %c0_9 = arith.constant 0 : index
    %9 = vector.load %arg4[%c0_8, %c0_9] : memref<1x128xf32, #tpu.memory_space<vmem>>, vector<1x128xf32>
    %10 = vector.broadcast %9 : vector<1x128xf32> to vector<64x128xf32>
    %11 = arith.addf %8, %10 : vector<64x128xf32>
    %12 = vector.shape_cast %11 : vector<64x128xf32> to vector<8x8x128xf32>
    %c0_10 = arith.constant 0 : index
    %c0_11 = arith.constant 0 : index
    %c0_12 = arith.constant 0 : index
    %13 = vector.load %arg10[%c0_10, %c0_11, %c0_12] : memref<8x8x128xf32, #tpu.memory_space<vmem>>, vector<8x8x128xf32>
    tpu.vector_store %arg10[%c0_10, %c0_11, %c0_12], %12 {strides = array<i32>} : memref<8x8x128xf32, #tpu.memory_space<vmem>>, vector<8x8x128xf32>,
    %c0_13 = arith.constant 0 : index
    %c0_14 = arith.constant 0 : index
    %14 = vector.load %arg5[%c0_13, %c0_14] : memref<1x128xf32, #tpu.memory_space<vmem>>, vector<1x128xf32>
    %cst_15 = arith.constant dense<0.000000e+00> : vector<64x128xf32>
    %15 = tpu.matmul %6, %14, %cst_15 {dimension_numbers = #tpu.dot_dimension_numbers<[1], [0], [0], [1], [0, 0, 1, 1], [], []>} : vector<64x1xf32>, vector<1x128xf32>, vector<64x128xf32> -> vector<64x128xf32>
    %c0_16 = arith.constant 0 : index
    %c0_17 = arith.constant 0 : index
    %16 = vector.load %arg6[%c0_16, %c0_17] : memref<1x128xf32, #tpu.memory_space<vmem>>, vector<1x128xf32>
    %17 = vector.broadcast %16 : vector<1x128xf32> to vector<64x128xf32>
    %18 = arith.addf %15, %17 : vector<64x128xf32>
    %19 = vector.shape_cast %18 : vector<64x128xf32> to vector<8x8x128xf32>
    %c0_18 = arith.constant 0 : index
    %c0_19 = arith.constant 0 : index
    %c0_20 = arith.constant 0 : index
    %20 = vector.load %arg11[%c0_18, %c0_19, %c0_20] : memref<8x8x128xf32, #tpu.memory_space<vmem>>, vector<8x8x128xf32>
    tpu.vector_store %arg11[%c0_18, %c0_19, %c0_20], %19 {strides = array<i32>} : memref<8x8x128xf32, #tpu.memory_space<vmem>>, vector<8x8x128xf32>,
    %c0_21 = arith.constant 0 : index
    %c0_22 = arith.constant 0 : index
    %21 = vector.load %arg12[%c0_21, %c0_22] : memref<8x256xf32, #tpu.memory_space<vmem>>, vector<8x256xf32>
    %c0_i32_23 = arith.constant 0 : i32
    %22 = arith.index_cast %c0_i32_23 : i32 to index
    %c0_24 = arith.constant 0 : index
    %c0_25 = arith.constant 0 : index
    %23 = vector.load %arg10[%22, %c0_24, %c0_25] : memref<8x8x128xf32, #tpu.memory_space<vmem>>, vector<1x8x128xf32>
    %24 = vector.shape_cast %23 : vector<1x8x128xf32> to vector<8x128xf32>
    %c7_i32 = arith.constant 7 : i32
    %25 = arith.subi %c7_i32, %c0_i32_23 : i32
    %26 = arith.index_cast %25 : i32 to index
    %c0_26 = arith.constant 0 : index
    %c0_27 = arith.constant 0 : index
    %27 = vector.load %arg11[%26, %c0_26, %c0_27] : memref<8x8x128xf32, #tpu.memory_space<vmem>>, vector<1x8x128xf32>
    %28 = vector.shape_cast %27 : vector<1x8x128xf32> to vector<8x128xf32>
    %29 = tpu.concatenate %24, %28 in 1 : vector<8x128xf32>, vector<8x128xf32> -> vector<8x256xf32>
    %c0_28 = arith.constant 0 : index
    %c0_29 = arith.constant 0 : index
    %30 = vector.load %arg7[%c0_28, %c0_29] : memref<256x256xf32, #tpu.memory_space<vmem>>, vector<256x256xf32>
    %cst_30 = arith.constant dense<0.000000e+00> : vector<8x256xf32>
    %31 = tpu.matmul %21, %30, %cst_30 {dimension_numbers = #tpu.dot_dimension_numbers<[1], [0], [0], [1], [0, 0, 1, 1], [], []>} : vector<8x256xf32>, vector<256x256xf32>, vector<8x256xf32> -> vector<8x256xf32>
    %32 = arith.addf %29, %31 : vector<8x256xf32>
    %33 = math.tanh %32 : vector<8x256xf32>
    %c1_i32 = arith.constant 1 : i32
    %34 = arith.index_cast %c1_i32 : i32 to index
    %c0_31 = arith.constant 0 : index
    %c0_32 = arith.constant 0 : index
    %35 = vector.load %arg10[%34, %c0_31, %c0_32] : memref<8x8x128xf32, #tpu.memory_space<vmem>>, vector<1x8x128xf32>
    %36 = vector.shape_cast %35 : vector<1x8x128xf32> to vector<8x128xf32>
    %c7_i32_33 = arith.constant 7 : i32
    %37 = arith.subi %c7_i32_33, %c1_i32 : i32
    %38 = arith.index_cast %37 : i32 to index
    %c0_34 = arith.constant 0 : index
    %c0_35 = arith.constant 0 : index
    %39 = vector.load %arg11[%38, %c0_34, %c0_35] : memref<8x8x128xf32, #tpu.memory_space<vmem>>, vector<1x8x128xf32>
    %40 = vector.shape_cast %39 : vector<1x8x128xf32> to vector<8x128xf32>
    %41 = tpu.concatenate %36, %40 in 1 : vector<8x128xf32>, vector<8x128xf32> -> vector<8x256xf32>
    %c0_36 = arith.constant 0 : index
    %c0_37 = arith.constant 0 : index
    %42 = vector.load %arg7[%c0_36, %c0_37] : memref<256x256xf32, #tpu.memory_space<vmem>>, vector<256x256xf32>
    %cst_38 = arith.constant dense<0.000000e+00> : vector<8x256xf32>
    %43 = tpu.matmul %33, %42, %cst_38 {dimension_numbers = #tpu.dot_dimension_numbers<[1], [0], [0], [1], [0, 0, 1, 1], [], []>} : vector<8x256xf32>, vector<256x256xf32>, vector<8x256xf32> -> vector<8x256xf32>
    %44 = arith.addf %41, %43 : vector<8x256xf32>
    %45 = math.tanh %44 : vector<8x256xf32>
    %c2_i32 = arith.constant 2 : i32
    %46 = arith.index_cast %c2_i32 : i32 to index
    %c0_39 = arith.constant 0 : index
    %c0_40 = arith.constant 0 : index
    %47 = vector.load %arg10[%46, %c0_39, %c0_40] : memref<8x8x128xf32, #tpu.memory_space<vmem>>, vector<1x8x128xf32>
    %48 = vector.shape_cast %47 : vector<1x8x128xf32> to vector<8x128xf32>
    %c7_i32_41 = arith.constant 7 : i32
    %49 = arith.subi %c7_i32_41, %c2_i32 : i32
    %50 = arith.index_cast %49 : i32 to index
    %c0_42 = arith.constant 0 : index
    %c0_43 = arith.constant 0 : index
    %51 = vector.load %arg11[%50, %c0_42, %c0_43] : memref<8x8x128xf32, #tpu.memory_space<vmem>>, vector<1x8x128xf32>
    %52 = vector.shape_cast %51 : vector<1x8x128xf32> to vector<8x128xf32>
    %53 = tpu.concatenate %48, %52 in 1 : vector<8x128xf32>, vector<8x128xf32> -> vector<8x256xf32>
    %c0_44 = arith.constant 0 : index
    %c0_45 = arith.constant 0 : index
    %54 = vector.load %arg7[%c0_44, %c0_45] : memref<256x256xf32, #tpu.memory_space<vmem>>, vector<256x256xf32>
    %cst_46 = arith.constant dense<0.000000e+00> : vector<8x256xf32>
    %55 = tpu.matmul %45, %54, %cst_46 {dimension_numbers = #tpu.dot_dimension_numbers<[1], [0], [0], [1], [0, 0, 1, 1], [], []>} : vector<8x256xf32>, vector<256x256xf32>, vector<8x256xf32> -> vector<8x256xf32>
    %56 = arith.addf %53, %55 : vector<8x256xf32>
    %57 = math.tanh %56 : vector<8x256xf32>
    %c3_i32 = arith.constant 3 : i32
    %58 = arith.index_cast %c3_i32 : i32 to index
    %c0_47 = arith.constant 0 : index
    %c0_48 = arith.constant 0 : index
    %59 = vector.load %arg10[%58, %c0_47, %c0_48] : memref<8x8x128xf32, #tpu.memory_space<vmem>>, vector<1x8x128xf32>
    %60 = vector.shape_cast %59 : vector<1x8x128xf32> to vector<8x128xf32>
    %c7_i32_49 = arith.constant 7 : i32
    %61 = arith.subi %c7_i32_49, %c3_i32 : i32
    %62 = arith.index_cast %61 : i32 to index
    %c0_50 = arith.constant 0 : index
    %c0_51 = arith.constant 0 : index
    %63 = vector.load %arg11[%62, %c0_50, %c0_51] : memref<8x8x128xf32, #tpu.memory_space<vmem>>, vector<1x8x128xf32>
    %64 = vector.shape_cast %63 : vector<1x8x128xf32> to vector<8x128xf32>
    %65 = tpu.concatenate %60, %64 in 1 : vector<8x128xf32>, vector<8x128xf32> -> vector<8x256xf32>
    %c0_52 = arith.constant 0 : index
    %c0_53 = arith.constant 0 : index
    %66 = vector.load %arg7[%c0_52, %c0_53] : memref<256x256xf32, #tpu.memory_space<vmem>>, vector<256x256xf32>
    %cst_54 = arith.constant dense<0.000000e+00> : vector<8x256xf32>
    %67 = tpu.matmul %57, %66, %cst_54 {dimension_numbers = #tpu.dot_dimension_numbers<[1], [0], [0], [1], [0, 0, 1, 1], [], []>} : vector<8x256xf32>, vector<256x256xf32>, vector<8x256xf32> -> vector<8x256xf32>
    %68 = arith.addf %65, %67 : vector<8x256xf32>
    %69 = math.tanh %68 : vector<8x256xf32>
    %c4_i32 = arith.constant 4 : i32
    %70 = arith.index_cast %c4_i32 : i32 to index
    %c0_55 = arith.constant 0 : index
    %c0_56 = arith.constant 0 : index
    %71 = vector.load %arg10[%70, %c0_55, %c0_56] : memref<8x8x128xf32, #tpu.memory_space<vmem>>, vector<1x8x128xf32>
    %72 = vector.shape_cast %71 : vector<1x8x128xf32> to vector<8x128xf32>
    %c7_i32_57 = arith.constant 7 : i32
    %73 = arith.subi %c7_i32_57, %c4_i32 : i32
    %74 = arith.index_cast %73 : i32 to index
    %c0_58 = arith.constant 0 : index
    %c0_59 = arith.constant 0 : index
    %75 = vector.load %arg11[%74, %c0_58, %c0_59] : memref<8x8x128xf32, #tpu.memory_space<vmem>>, vector<1x8x128xf32>
    %76 = vector.shape_cast %75 : vector<1x8x128xf32> to vector<8x128xf32>
    %77 = tpu.concatenate %72, %76 in 1 : vector<8x128xf32>, vector<8x128xf32> -> vector<8x256xf32>
    %c0_60 = arith.constant 0 : index
    %c0_61 = arith.constant 0 : index
    %78 = vector.load %arg7[%c0_60, %c0_61] : memref<256x256xf32, #tpu.memory_space<vmem>>, vector<256x256xf32>
    %cst_62 = arith.constant dense<0.000000e+00> : vector<8x256xf32>
    %79 = tpu.matmul %69, %78, %cst_62 {dimension_numbers = #tpu.dot_dimension_numbers<[1], [0], [0], [1], [0, 0, 1, 1], [], []>} : vector<8x256xf32>, vector<256x256xf32>, vector<8x256xf32> -> vector<8x256xf32>
    %80 = arith.addf %77, %79 : vector<8x256xf32>
    %81 = math.tanh %80 : vector<8x256xf32>
    %c5_i32 = arith.constant 5 : i32
    %82 = arith.index_cast %c5_i32 : i32 to index
    %c0_63 = arith.constant 0 : index
    %c0_64 = arith.constant 0 : index
    %83 = vector.load %arg10[%82, %c0_63, %c0_64] : memref<8x8x128xf32, #tpu.memory_space<vmem>>, vector<1x8x128xf32>
    %84 = vector.shape_cast %83 : vector<1x8x128xf32> to vector<8x128xf32>
    %c7_i32_65 = arith.constant 7 : i32
    %85 = arith.subi %c7_i32_65, %c5_i32 : i32
    %86 = arith.index_cast %85 : i32 to index
    %c0_66 = arith.constant 0 : index
    %c0_67 = arith.constant 0 : index
    %87 = vector.load %arg11[%86, %c0_66, %c0_67] : memref<8x8x128xf32, #tpu.memory_space<vmem>>, vector<1x8x128xf32>
    %88 = vector.shape_cast %87 : vector<1x8x128xf32> to vector<8x128xf32>
    %89 = tpu.concatenate %84, %88 in 1 : vector<8x128xf32>, vector<8x128xf32> -> vector<8x256xf32>
    %c0_68 = arith.constant 0 : index
    %c0_69 = arith.constant 0 : index
    %90 = vector.load %arg7[%c0_68, %c0_69] : memref<256x256xf32, #tpu.memory_space<vmem>>, vector<256x256xf32>
    %cst_70 = arith.constant dense<0.000000e+00> : vector<8x256xf32>
    %91 = tpu.matmul %81, %90, %cst_70 {dimension_numbers = #tpu.dot_dimension_numbers<[1], [0], [0], [1], [0, 0, 1, 1], [], []>} : vector<8x256xf32>, vector<256x256xf32>, vector<8x256xf32> -> vector<8x256xf32>
    %92 = arith.addf %89, %91 : vector<8x256xf32>
    %93 = math.tanh %92 : vector<8x256xf32>
    %c6_i32 = arith.constant 6 : i32
    %94 = arith.index_cast %c6_i32 : i32 to index
    %c0_71 = arith.constant 0 : index
    %c0_72 = arith.constant 0 : index
    %95 = vector.load %arg10[%94, %c0_71, %c0_72] : memref<8x8x128xf32, #tpu.memory_space<vmem>>, vector<1x8x128xf32>
    %96 = vector.shape_cast %95 : vector<1x8x128xf32> to vector<8x128xf32>
    %c7_i32_73 = arith.constant 7 : i32
    %97 = arith.subi %c7_i32_73, %c6_i32 : i32
    %98 = arith.index_cast %97 : i32 to index
    %c0_74 = arith.constant 0 : index
    %c0_75 = arith.constant 0 : index
    %99 = vector.load %arg11[%98, %c0_74, %c0_75] : memref<8x8x128xf32, #tpu.memory_space<vmem>>, vector<1x8x128xf32>
    %100 = vector.shape_cast %99 : vector<1x8x128xf32> to vector<8x128xf32>
    %101 = tpu.concatenate %96, %100 in 1 : vector<8x128xf32>, vector<8x128xf32> -> vector<8x256xf32>
    %c0_76 = arith.constant 0 : index
    %c0_77 = arith.constant 0 : index
    %102 = vector.load %arg7[%c0_76, %c0_77] : memref<256x256xf32, #tpu.memory_space<vmem>>, vector<256x256xf32>
    %cst_78 = arith.constant dense<0.000000e+00> : vector<8x256xf32>
    %103 = tpu.matmul %93, %102, %cst_78 {dimension_numbers = #tpu.dot_dimension_numbers<[1], [0], [0], [1], [0, 0, 1, 1], [], []>} : vector<8x256xf32>, vector<256x256xf32>, vector<8x256xf32> -> vector<8x256xf32>
    %104 = arith.addf %101, %103 : vector<8x256xf32>
    %105 = math.tanh %104 : vector<8x256xf32>
    %c7_i32_79 = arith.constant 7 : i32
    %106 = arith.index_cast %c7_i32_79 : i32 to index
    %c0_80 = arith.constant 0 : index
    %c0_81 = arith.constant 0 : index
    %107 = vector.load %arg10[%106, %c0_80, %c0_81] : memref<8x8x128xf32, #tpu.memory_space<vmem>>, vector<1x8x128xf32>
    %108 = vector.shape_cast %107 : vector<1x8x128xf32> to vector<8x128xf32>
    %c7_i32_82 = arith.constant 7 : i32
    %109 = arith.subi %c7_i32_82, %c7_i32_79 : i32
    %110 = arith.index_cast %109 : i32 to index
    %c0_83 = arith.constant 0 : index
    %c0_84 = arith.constant 0 : index
    %111 = vector.load %arg11[%110, %c0_83, %c0_84] : memref<8x8x128xf32, #tpu.memory_space<vmem>>, vector<1x8x128xf32>
    %112 = vector.shape_cast %111 : vector<1x8x128xf32> to vector<8x128xf32>
    %113 = tpu.concatenate %108, %112 in 1 : vector<8x128xf32>, vector<8x128xf32> -> vector<8x256xf32>
    %c0_85 = arith.constant 0 : index
    %c0_86 = arith.constant 0 : index
    %114 = vector.load %arg7[%c0_85, %c0_86] : memref<256x256xf32, #tpu.memory_space<vmem>>, vector<256x256xf32>
    %cst_87 = arith.constant dense<0.000000e+00> : vector<8x256xf32>
    %115 = tpu.matmul %105, %114, %cst_87 {dimension_numbers = #tpu.dot_dimension_numbers<[1], [0], [0], [1], [0, 0, 1, 1], [], []>} : vector<8x256xf32>, vector<256x256xf32>, vector<8x256xf32> -> vector<8x256xf32>
    %116 = arith.addf %113, %115 : vector<8x256xf32>
    %117 = math.tanh %116 : vector<8x256xf32>
    %c8_i32 = arith.constant 8 : i32
    %c0_88 = arith.constant 0 : index
    %c0_89 = arith.constant 0 : index
    %118 = vector.load %arg12[%c0_88, %c0_89] : memref<8x256xf32, #tpu.memory_space<vmem>>, vector<8x256xf32>
    tpu.vector_store %arg12[%c0_88, %c0_89], %117 {strides = array<i32>} : memref<8x256xf32, #tpu.memory_space<vmem>>, vector<8x256xf32>,
    %c0_i32_90 = arith.constant 0 : i32
    %119 = arith.cmpi eq, %arg0, %c0_i32_90 : i32
    %120 = arith.extui %119 : i1 to i32
    %c0_i32_91 = arith.constant 0 : i32
    %121 = arith.cmpi ne, %120, %c0_i32_91 : i32
    scf.if %121 {
      %122 = vector.extract_strided_slice %117 {offsets = [0, 0], sizes = [8, 128], strides = [1, 1]} : vector<8x256xf32> to vector<8x128xf32>
      %c0_92 = arith.constant 0 : index
      %c0_93 = arith.constant 0 : index
      %c0_94 = arith.constant 0 : index
      %123 = vector.load %arg9[%c0_92, %c0_93, %c0_94] : memref<2x8x128xf32, #tpu.memory_space<vmem>>, vector<1x8x128xf32>
      %124 = vector.shape_cast %123 : vector<1x8x128xf32> to vector<8x128xf32>
      %125 = vector.shape_cast %122 : vector<8x128xf32> to vector<1x8x128xf32>
      tpu.vector_store %arg9[%c0_92, %c0_93, %c0_94], %125 {strides = array<i32>} : memref<2x8x128xf32, #tpu.memory_space<vmem>>, vector<1x8x128xf32>,
      %126 = vector.extract_strided_slice %117 {offsets = [0, 128], sizes = [8, 128], strides = [1, 1]} : vector<8x256xf32> to vector<8x128xf32>
      %c1 = arith.constant 1 : index
      %c0_95 = arith.constant 0 : index
      %c0_96 = arith.constant 0 : index
      %127 = vector.load %arg9[%c1, %c0_95, %c0_96] : memref<2x8x128xf32, #tpu.memory_space<vmem>>, vector<1x8x128xf32>
      %128 = vector.shape_cast %127 : vector<1x8x128xf32> to vector<8x128xf32>
      %129 = vector.shape_cast %126 : vector<8x128xf32> to vector<1x8x128xf32>
      tpu.vector_store %arg9[%c1, %c0_95, %c0_96], %129 {strides = array<i32>} : memref<2x8x128xf32, #tpu.memory_space<vmem>>, vector<1x8x128xf32>,
    } else {
    }
    return
  }
  func.func @transform_0(%arg0: i32) -> (i32, i32, i32) {
    %c0_i32 = arith.constant 0 : i32
    %c0_i32_0 = arith.constant 0 : i32
    %c0_i32_1 = arith.constant 0 : i32
    return %arg0, %c0_i32, %c0_i32_0 : i32, i32, i32
  }
  func.func @transform_1(%arg0: i32) -> (i32, i32, i32) {
    %c0_i32 = arith.constant 0 : i32
    %0 = arith.subi %c0_i32, %arg0 : i32
    %c0_i32_0 = arith.constant 0 : i32
    %c0_i32_1 = arith.constant 0 : i32
    %c0_i32_2 = arith.constant 0 : i32
    return %0, %c0_i32_0, %c0_i32_1 : i32, i32, i32
  }
  func.func @transform_2(%arg0: i32) -> (i32, i32) {
    %c0_i32 = arith.constant 0 : i32
    %c0_i32_0 = arith.constant 0 : i32
    %c0_i32_1 = arith.constant 0 : i32
    return %c0_i32, %c0_i32_0 : i32, i32
  }
  func.func @transform_3(%arg0: i32) -> (i32, i32) {
    %c0_i32 = arith.constant 0 : i32
    %c0_i32_0 = arith.constant 0 : i32
    %c0_i32_1 = arith.constant 0 : i32
    return %c0_i32, %c0_i32_0 : i32, i32
  }
  func.func @transform_4(%arg0: i32) -> (i32, i32) {
    %c0_i32 = arith.constant 0 : i32
    %c0_i32_0 = arith.constant 0 : i32
    %c0_i32_1 = arith.constant 0 : i32
    return %c0_i32, %c0_i32_0 : i32, i32
  }
  func.func @transform_5(%arg0: i32) -> (i32, i32) {
    %c0_i32 = arith.constant 0 : i32
    %c0_i32_0 = arith.constant 0 : i32
    %c0_i32_1 = arith.constant 0 : i32
    return %c0_i32, %c0_i32_0 : i32, i32
  }
  func.func @transform_6(%arg0: i32) -> (i32, i32) {
    %c0_i32 = arith.constant 0 : i32
    %c0_i32_0 = arith.constant 0 : i32
    %c0_i32_1 = arith.constant 0 : i32
    return %c0_i32, %c0_i32_0 : i32, i32
  }
  func.func @transform_7(%arg0: i32) -> (i32, i32, i32) {
    %c0_i32 = arith.constant 0 : i32
    %c0_i32_0 = arith.constant 0 : i32
    %c0_i32_1 = arith.constant 0 : i32
    %c0_i32_2 = arith.constant 0 : i32
    return %c0_i32, %c0_i32_0, %c0_i32_1 : i32, i32, i32
  }
  func.func @transform_8(%arg0: i32) -> (i32, i32, i32) {
    %c0_i32 = arith.constant 0 : i32
    %c0_i32_0 = arith.constant 0 : i32
    %c0_i32_1 = arith.constant 0 : i32
    %c0_i32_2 = arith.constant 0 : i32
    return %c0_i32, %c0_i32_0, %c0_i32_1 : i32, i32, i32
  }
}

</mosaic_0001>

<bundles_post_ra>
// kernel: tpu_custom_call.1
= control target key start
LH: loop header
LB: loop body
LE: loop exit
PB: predicated region body
PF: predicated region fallthrough
CT: control target
= control target key end

     0   :  { %13 = vsyncpa [#allocation6], 0  ;;  %s2103_s0 = inlined_call_operand.vmem [shape: f32[8,8,1], index: 0, kind: input, shape index: {}]   ;;  %s2104_s1 = inlined_call_operand.vmem [shape: f32[8,8,1], index: 1, kind: input, shape index: {}]   ;;  %s2105_s2 = inlined_call_operand.vmem [shape: f32[1,128], index: 2, kind: input, shape index: {}]   ;;  %s2106_s3 = inlined_call_operand.vmem [shape: f32[1,128], index: 3, kind: input, shape index: {}]   ;;  %s2107_s4 = inlined_call_operand.vmem [shape: f32[1,128], index: 4, kind: input, shape index: {}]   ;;  %s2108_s5 = inlined_call_operand.vmem [shape: f32[1,128], index: 5, kind: input, shape index: {}]   ;;  %s2109_s6 = inlined_call_operand.hbm [shape: f32[256,256], index: 6, kind: input, shape index: {}]   ;;  %s2110_s7 = inlined_call_operand.vmem [shape: f32[2,8,128], index: 7, kind: input, shape index: {}]   ;;  %s2111_s8 = inlined_call_operand.hbm [shape: f32[2,8,128], index: 8, kind: output, shape index: {}]  }
   0x1   :  { %14 = vsyncpa [#allocation7], 0  ;;  %s39_s29 = sshll.u32 %s2109_s6, 4  ;;  %s1233_s30 = smov [#allocation5]   ;;  %s40_s29 = int_to_ptr.hbm [resolvable:$true] %s39_s29 }
   0x2   :  { %s41_s9 = sshll.u32 %s1233_s30, 4  ;;  %s1234_s10 = smov 256   ;;  %s42_s9 = int_to_ptr.vmem [resolvable:$true] %s41_s9 }
   0x3   :  { %s1235_s11 = smov 16  }
   0x4   :  { %47 = dma.hbm_to_vmem [thread:$0]  %s40_s29, 8192, %s42_s9, [#allocation6], %s1234_s10, %s1234_s10, %s1235_s11  }
   0x5   :  { %1229 = dma.done.wait [#allocation6], 8192  }
   0x6   :  { %1230 = vsyncadd [#allocation6], 4294959104  ;;  %v1287_v0 = vld [vmem:[#allocation5 + $0xf0] sm:$0xff]  ;;  %v1291_v2 = vld [vmem:[#allocation5 + $0xe0] sm:$0xff]  ;;  %vm123_vm0 = vcmask 1040384   ;;  %vm98_vm1 = vcmask 7168  }
   0x7   :  { %v1289_v1 = vld [vmem:[#allocation5 + $0x1f0] sm:$0xff]  ;;  %326 = vmatpush.msra.mxu2 %v1287_v0  ;;  %v1295_v3 = vld [vmem:[#allocation5 + $0x1e0] sm:$0xff]  ;;  %v86_v18 = vld [vmem:[%s2104_s1 + $0x8] sm:$0xff]  ;;  %s1237_s27 = smov 128   ;;  %s1238_s28 = smov 8  }
   0x8   :  { %346 = vmatpush.msra.mxu3 %v1289_v1  ;;  %v1297_v4 = vld [vmem:[#allocation5 + $0xd0] sm:$0xff]  ;;  %v1303_v6 = vld [vmem:[#allocation5 + $0xc0] sm:$0xff]  ;;  %v1412_v38 = vld [vmem:[#allocation5 + $0xf8] sm:$0xff] }
   0x9   :  { %v1299_v5 = vld [vmem:[#allocation5 + $0x1d0] sm:$0xff]  ;;  %327 = vmatpush.msra.mxu2 %v1291_v2  ;;  %v1305_v7 = vld [vmem:[#allocation5 + $0x1c0] sm:$0xff]  ;;  %v1414_v39 = vld [vmem:[#allocation5 + $0x1f8] sm:$0xff] }
   0xa   :  { %347 = vmatpush.msra.mxu3 %v1295_v3  ;;  %v176_v8 = vld [vmem:[%s2107_s4] sm:$0x1]  ;;  %v1315_v10 = vld [vmem:[#allocation5 + $0xb0] sm:$0xff]  ;;  %v88_v40 = vld [vmem:[%s2104_s1 + $0x18] sm:$0xff] }
   0xb   :  { %328 = vmatpush.msra.mxu2 %v1297_v4  ;;  %v85_v9 = vld [vmem:[%s2104_s1] sm:$0xff]  ;;  %v1317_v11 = vld [vmem:[#allocation5 + $0x1b0] sm:$0xff]  ;;  %1068 = vmatpush.msk.msra.mxu1 %vm123_vm0, %v176_v8  ;;  %v1428_v42 = vld [vmem:[#allocation5 + $0xe8] sm:$0xff] }
   0xc   :  { %348 = vmatpush.msra.mxu3 %v1299_v5  ;;  %v1322_v12 = vld [vmem:[#allocation5 + $0xa0] sm:$0xff]  ;;  %1069 = vmatmul.msk.f32.vlgmr.msra.gmra.mxu1 %vm98_vm1, %v85_v9  ;;  %v1329_v14 = vld [vmem:[#allocation5 + $0x90] sm:$0xff]  ;;  %v1430_v43 = vld [vmem:[#allocation5 + $0x1e8] sm:$0xff] }
   0xd   :  { %329 = vmatpush.msra.mxu2 %v1303_v6  ;;  %v1324_v13 = vld [vmem:[#allocation5 + $0x1a0] sm:$0xff]  ;;  %v1331_v15 = vld [vmem:[#allocation5 + $0x190] sm:$0xff]  ;;  %434 = vmatpush.msrb.mxu1 %v1289_v1  ;;  %v1437_v44 = vld [vmem:[%s2110_s7 + $0x8] sm:$0xff] }
   0xe   :  { %349 = vmatpush.msra.mxu3 %v1305_v7  ;;  %v1336_v16 = vld [vmem:[#allocation5 + $0x80] sm:$0xff]  ;;  %v1346_v19 = vld [vmem:[#allocation5 + $0x70] sm:$0xff]  ;;  %v1439_v45 = vld [vmem:[#allocation5 + $0xd8] sm:$0xff] }
   0xf   :  { %330 = vmatpush.msra.mxu2 %v1315_v10  ;;  %v1338_v17 = vld [vmem:[#allocation5 + $0x180] sm:$0xff]  ;;  %435 = vmatpush.msrb.mxu1 %v1295_v3  ;;  %v1348_v20 = vld [vmem:[#allocation5 + $0x170] sm:$0xff]  ;;  %v1441_v46 = vld [vmem:[#allocation5 + $0x1d8] sm:$0xff] }
  0x10   :  { %350 = vmatpush.msra.mxu3 %v1317_v11  ;;  %v1353_v21 = vld [vmem:[#allocation5 + $0x60] sm:$0xff]  ;;  %v1360_v23 = vld [vmem:[#allocation5 + $0x50] sm:$0xff]  ;;  %v1447_v47 = vld [vmem:[#allocation5 + $0xc8] sm:$0xff] }
  0x11   :  { %331 = vmatpush.msra.mxu2 %v1322_v12  ;;  %436 = vmatpush.msrb.mxu1 %v1299_v5  ;;  %v1355_v22 = vld [vmem:[#allocation5 + $0x160] sm:$0xff]  ;;  %2153 = vst [vmem:[#allocation12_spill] sm:$0xff] %v1360_v23  ;;  %v1362_v24 = vld [vmem:[#allocation5 + $0x150] sm:$0xff]  ;;  %v1449_v48 = vld [vmem:[#allocation5 + $0x1c8] sm:$0xff] }
  0x12   :  { %351 = vmatpush.msra.mxu3 %v1324_v13  ;;  %2152 = vst [vmem:[#allocation11_spill] sm:$0xff] %v1355_v22  ;;  %v1367_v25 = vld [vmem:[#allocation5 + $0x40] sm:$0xff]  ;;  %v87_v27 = vld [vmem:[%s2104_s1 + $0x10] sm:$0xff]  ;;  %v1455_v49 = vld [vmem:[#allocation5 + $0xb8] sm:$0xff] }
  0x13   :  { %332 = vmatpush.msra.mxu2 %v1329_v14  ;;  %2154 = vst [vmem:[#allocation13_spill] sm:$0xff] %v1362_v24  ;;  %437 = vmatpush.msrb.mxu1 %v1305_v7  ;;  %v1369_v26 = vld [vmem:[#allocation5 + $0x140] sm:$0xff]  ;;  %v1377_v28 = vld [vmem:[#allocation5 + $0x30] sm:$0xff]  ;;  %v1457_v50 = vld [vmem:[#allocation5 + $0x1b8] sm:$0xff] }
  0x14   :  { %352 = vmatpush.msra.mxu3 %v1331_v15  ;;  %1070 = vmatmul.msk.f32.gmra.mxu1 %vm98_vm1, %v86_v18  ;;  %2155 = vst [vmem:[#allocation14_spill] sm:$0xff] %v1369_v26  ;;  %v1379_v29 = vld [vmem:[#allocation5 + $0x130] sm:$0xff]  ;;  %v1384_v30 = vld [vmem:[#allocation5 + $0x20] sm:$0xff]  ;;  %v1466_v52 = vld [vmem:[#allocation5 + $0xa8] sm:$0xff] }
  0x15   :  { %333 = vmatpush.msra.mxu2 %v1336_v16  ;;  %438 = vmatpush.msrb.mxu1 %v1317_v11  ;;  %2156 = vst [vmem:[#allocation15_spill] sm:$0xff] %v1379_v29  ;;  %v1386_v31 = vld [vmem:[#allocation5 + $0x120] sm:$0xff]  ;;  %v1391_v32 = vld [vmem:[#allocation5 + $0x10] sm:$0xff]  ;;  %v1468_v53 = vld [vmem:[#allocation5 + $0x1a8] sm:$0xff] }
  0x16   :  { %353 = vmatpush.msra.mxu3 %v1338_v17  ;;  %2157 = vst [vmem:[#allocation16_spill] sm:$0xff] %v1386_v31  ;;  %v1393_v33 = vld [vmem:[#allocation5 + $0x110] sm:$0xff]  ;;  %v93_v34 = vld [vmem:[%s2105_s2] sm:$0x1]  ;;  %v1474_v54 = vld [vmem:[#allocation5 + $0x98] sm:$0xff] }
  0x17   :  { %334 = vmatpush.msra.mxu2 %v1346_v19  ;;  %439 = vmatpush.msrb.mxu1 %v1324_v13  ;;  %2158 = vst [vmem:[#allocation17_spill] sm:$0xff] %v1391_v32  ;;  %v1401_v35 = vld [vmem:[#allocation5] sm:$0xff]  ;;  %v1476_v55 = vld [vmem:[#allocation5 + $0x198] sm:$0xff]  ;;  %v1482_v56 = vld [vmem:[#allocation5 + $0x88] sm:$0xff] }
  0x18   :  { %354 = vmatpush.msra.mxu3 %v1348_v20  ;;  %2159 = vst [vmem:[#allocation18_spill] sm:$0xff] %v1393_v33  ;;  %v1403_v36 = vld [vmem:[#allocation5 + $0x100] sm:$0xff]  ;;  %1059 = vmatpush.msk.msra.mxu0 %vm123_vm0, %v93_v34  ;;  %v1484_v57 = vld [vmem:[#allocation5 + $0x188] sm:$0xff]  ;;  %v1490_v58 = vld [vmem:[#allocation5 + $0x78] sm:$0xff] }
  0x19   :  { %335 = vmatpush.msra.mxu2 %v1353_v21  ;;  %440 = vmatpush.msrb.mxu1 %v1331_v15  ;;  %2160 = vst [vmem:[#allocation19_spill] sm:$0xff] %v1401_v35  ;;  %v77_v37 = vld [vmem:[%s2103_s0] sm:$0xff]  ;;  %v1492_v59 = vld [vmem:[#allocation5 + $0x178] sm:$0xff]  ;;  %v90_v60 = vld [vmem:[%s2104_s1 + $0x28] sm:$0xff] }
  0x1a   :  { %355 = vmatpush.msra.mxu3 %v1355_v22  ;;  %2161 = vst [vmem:[#allocation20_spill] sm:$0xff] %v1403_v36  ;;  %v1422_v41 = vld [vmem:[%s2110_s7] sm:$0xff]  ;;  %1060 = vmatmul.msk.f32.vlgmr.msra.gmra.mxu0 %vm98_vm1, %v77_v37  ;;  %v1501_v61 = vld [vmem:[#allocation5 + $0x68] sm:$0xff]  ;;  %v1509_v63 = vld [vmem:[#allocation5 + $0x58] sm:$0xff]  ;;  %s1039_s7 = sshll.u32 %s2111_s8, 4  ;;  %s1040_s7 = int_to_ptr.hbm [resolvable:$true] %s1039_s7 }
  0x1b   :  { %336 = vmatpush.msra.mxu2 %v1360_v23  ;;  %441 = vmatpush.msrb.mxu1 %v1338_v17  ;;  %v89_v51 = vld [vmem:[%s2104_s1 + $0x20] sm:$0xff]  ;;  %v1503_v62 = vld [vmem:[#allocation5 + $0x168] sm:$0xff]  ;;  %v1511_v8 = vld [vmem:[#allocation5 + $0x158] sm:$0xff] }
  0x1c   :  { %356 = vmatpush.msra.mxu3 %v1362_v24  ;;  %1071 = vmatmul.msk.f32.gmra.mxu1 %vm98_vm1, %v87_v27  ;;  %2162 = vst [vmem:[#allocation21_spill] sm:$0xff] %v1503_v62  ;;  %v1517_v9 = vld [vmem:[#allocation5 + $0x48] sm:$0xff]  ;;  %v1525_v27 = vld [vmem:[#allocation5 + $0x38] sm:$0xff]  ;;  %v91_v37 = vld [vmem:[%s2104_s1 + $0x30] sm:$0xff] }
  0x1d   :  { %337 = vmatpush.msra.mxu2 %v1367_v25  ;;  %442 = vmatpush.msrb.mxu1 %v1348_v20  ;;  %2163 = vst [vmem:[#allocation22_spill] sm:$0xff] %v1511_v8  ;;  %v1519_v18 = vld [vmem:[#allocation5 + $0x148] sm:$0xff]  ;;  %v1527_v34 = vld [vmem:[#allocation5 + $0x138] sm:$0xff] }
  0x1e   :  { %357 = vmatpush.msra.mxu3 %v1369_v26  ;;  %414 = vmatpush.msrb.mxu0 %v1287_v0  ;;  %2164 = vst [vmem:[#allocation23_spill] sm:$0xff] %v1519_v18 }
  0x1f   :  { %338 = vmatpush.msra.mxu2 %v1377_v28  ;;  %443 = vmatpush.msrb.mxu1 %v1355_v22  ;;  %2165 = vst [vmem:[#allocation24_spill] sm:$0xff] %v1527_v34 }
  0x20   :  { %358 = vmatpush.msra.mxu3 %v1379_v29  ;;  %415 = vmatpush.msrb.mxu0 %v1291_v2 }
  0x21   :  { %339 = vmatpush.msra.mxu2 %v1384_v30  ;;  %444 = vmatpush.msrb.mxu1 %v1362_v24 }
  0x22   :  { %359 = vmatpush.msra.mxu3 %v1386_v31  ;;  %416 = vmatpush.msrb.mxu0 %v1297_v4 }
  0x23   :  { %340 = vmatpush.msra.mxu2 %v1391_v32  ;;  %445 = vmatpush.msrb.mxu1 %v1369_v26 }
  0x24   :  { %360 = vmatpush.msra.mxu3 %v1393_v33  ;;  %1072 = vmatmul.msk.f32.gmra.mxu1 %vm98_vm1, %v88_v40  ;;  %v1536_v40 = vld [vmem:[#allocation5 + $0x28] sm:$0xff] }
  0x25   :  { %341 = vmatpush.msra.mxu2 %v1401_v35  ;;  %417 = vmatpush.msrb.mxu0 %v1303_v6  ;;  %2166 = vst [vmem:[#allocation25_spill] sm:$0xff] %v1536_v40 }
  0x26   :  { %361 = vmatpush.msra.mxu3 %v1403_v36  ;;  %342 = vmatmul.f32.vlgmr.msra.gmra.mxu2 %v1422_v41 }
  0x27   :  { %366 = vmatpush.msrb.mxu2 %v1412_v38  ;;  %362 = vmatmul.f32.vlgmr.msra.gmra.mxu3 %v1437_v44 }
  0x28   :  { %386 = vmatpush.msrb.mxu3 %v1414_v39  ;;  %418 = vmatpush.msrb.mxu0 %v1315_v10 }
  0x29   :  { %367 = vmatpush.msrb.mxu2 %v1428_v42  ;;  %446 = vmatpush.msrb.mxu1 %v1379_v29 }
  0x2a   :  { %387 = vmatpush.msrb.mxu3 %v1430_v43  ;;  %419 = vmatpush.msrb.mxu0 %v1322_v12 }
  0x2b   :  { %368 = vmatpush.msrb.mxu2 %v1439_v45  ;;  %447 = vmatpush.msrb.mxu1 %v1386_v31 }
  0x2c   :  { %388 = vmatpush.msrb.mxu3 %v1441_v46  ;;  %1073 = vmatmul.msk.f32.gmra.mxu1 %vm98_vm1, %v89_v51  ;;  %v1538_v51 = vld [vmem:[#allocation5 + $0x128] sm:$0xff] }
  0x2d   :  { %369 = vmatpush.msrb.mxu2 %v1447_v47  ;;  %420 = vmatpush.msrb.mxu0 %v1329_v14  ;;  %2167 = vst [vmem:[#allocation26_spill] sm:$0xff] %v1538_v51 }
  0x2e   :  { %389 = vmatpush.msrb.mxu3 %v1449_v48  ;;  %448 = vmatpush.msrb.mxu1 %v1393_v33  ;;  %v1552_v33 = vld [vmem:[#allocation5 + $0x8] sm:$0xff] }
  0x2f   :  { %370 = vmatpush.msrb.mxu2 %v1455_v49  ;;  %421 = vmatpush.msrb.mxu0 %v1336_v16  ;;  %2170 = vst [vmem:[#allocation29_spill] sm:$0xff] %v1552_v33 }
  0x30   :  { %390 = vmatpush.msrb.mxu3 %v1457_v50  ;;  %449 = vmatpush.msrb.mxu1 %v1403_v36  ;;  %v1546_v36 = vld [vmem:[#allocation5 + $0x118] sm:$0xff] }
  0x31   :  { %371 = vmatpush.msrb.mxu2 %v1466_v52  ;;  %422 = vmatpush.msrb.mxu0 %v1346_v19  ;;  %2169 = vst [vmem:[#allocation28_spill] sm:$0xff] %v1546_v36 }
  0x32   :  { %391 = vmatpush.msrb.mxu3 %v1468_v53  ;;  %522 = vmatpush.msra.mxu1 %v1289_v1 }
  0x33   :  { %372 = vmatpush.msrb.mxu2 %v1474_v54  ;;  %423 = vmatpush.msrb.mxu0 %v1353_v21 }
  0x34   :  { %392 = vmatpush.msrb.mxu3 %v1476_v55  ;;  %1074 = vmatmul.msk.f32.gmra.mxu1 %vm98_vm1, %v90_v60  ;;  %v1544_v60 = vld [vmem:[#allocation5 + $0x18] sm:$0xff] }
  0x35   :  { %373 = vmatpush.msrb.mxu2 %v1482_v56  ;;  %424 = vmatpush.msrb.mxu0 %v1360_v23  ;;  %2168 = vst [vmem:[#allocation27_spill] sm:$0xff] %v1544_v60  ;;  %v1554_v23 = vld [vmem:[#allocation5 + $0x108] sm:$0xff] }
  0x36   :  { %393 = vmatpush.msrb.mxu3 %v1484_v57  ;;  %2171 = vst [vmem:[#allocation30_spill] sm:$0xff] %v1554_v23  ;;  %523 = vmatpush.msra.mxu1 %v1295_v3 }
  0x37   :  { %374 = vmatpush.msrb.mxu2 %v1490_v58  ;;  %425 = vmatpush.msrb.mxu0 %v1367_v25 }
  0x38   :  { %394 = vmatpush.msrb.mxu3 %v1492_v59  ;;  %524 = vmatpush.msra.mxu1 %v1299_v5 }
  0x39   :  { %375 = vmatpush.msrb.mxu2 %v1501_v61  ;;  %426 = vmatpush.msrb.mxu0 %v1377_v28 }
  0x3a   :  { %395 = vmatpush.msrb.mxu3 %v1503_v62  ;;  %525 = vmatpush.msra.mxu1 %v1305_v7 }
  0x3b   :  { %376 = vmatpush.msrb.mxu2 %v1509_v63  ;;  %427 = vmatpush.msrb.mxu0 %v1384_v30 }
  0x3c   :  { %396 = vmatpush.msrb.mxu3 %v1511_v8  ;;  %1075 = vmatmul.msk.f32.gmra.mxu1 %vm98_vm1, %v91_v37  ;;  %v92_v37 = vld [vmem:[%s2104_s1 + $0x38] sm:$0xff] }
  0x3d   :  { %377 = vmatpush.msrb.mxu2 %v1517_v9  ;;  %428 = vmatpush.msrb.mxu0 %v1391_v32 }
  0x3e   :  { %397 = vmatpush.msrb.mxu3 %v1519_v18  ;;  %526 = vmatpush.msra.mxu1 %v1317_v11 }
  0x3f   :  { %378 = vmatpush.msrb.mxu2 %v1525_v27  ;;  %429 = vmatpush.msrb.mxu0 %v1401_v35 }
  0x40   :  { %398 = vmatpush.msrb.mxu3 %v1527_v34  ;;  %527 = vmatpush.msra.mxu1 %v1324_v13 }
  0x41   :  { %379 = vmatpush.msrb.mxu2 %v1536_v40  ;;  %502 = vmatpush.msra.mxu0 %v1287_v0 }
  0x42   :  { %399 = vmatpush.msrb.mxu3 %v1538_v51  ;;  %528 = vmatpush.msra.mxu1 %v1331_v15 }
  0x43   :  { %380 = vmatpush.msrb.mxu2 %v1544_v60  ;;  %503 = vmatpush.msra.mxu0 %v1291_v2 }
  0x44   :  { %400 = vmatpush.msrb.mxu3 %v1546_v36  ;;  %1076 = vmatmul.msk.f32.gmra.mxu1 %vm98_vm1, %v92_v37  ;;  %v2174_v37 = vld [vmem:[#allocation20_spill] sm:$0xff] }
  0x45   :  { %381 = vmatpush.msrb.mxu2 %v1552_v33  ;;  %504 = vmatpush.msra.mxu0 %v1297_v4 }
  0x46   :  { %401 = vmatpush.msrb.mxu3 %v1554_v23  ;;  %382 = vmatmul.f32.vlgmr.msrb.gmra.mxu2 %v1422_v41  ;;  %v2172_v41 = vld [vmem:[#allocation12_spill] sm:$0xff] }
  0x47   :  { %402 = vmatmul.f32.vlgmr.msrb.gmra.mxu3 %v1437_v44  ;;  %454 = vmatpush.msra.mxu2 %v1412_v38  ;;  %v2173_v44 = vld [vmem:[#allocation18_spill] sm:$0xff] }
  0x48   :  { %474 = vmatpush.msra.mxu3 %v1414_v39  ;;  %505 = vmatpush.msra.mxu0 %v1303_v6 }
  0x49   :  { %455 = vmatpush.msra.mxu2 %v1428_v42  ;;  %529 = vmatpush.msra.mxu1 %v1338_v17 }
  0x4a   :  { %475 = vmatpush.msra.mxu3 %v1430_v43  ;;  %506 = vmatpush.msra.mxu0 %v1315_v10 }
  0x4b   :  { %456 = vmatpush.msra.mxu2 %v1439_v45  ;;  %530 = vmatpush.msra.mxu1 %v1348_v20 }
  0x4c   :  { %476 = vmatpush.msra.mxu3 %v1441_v46  ;;  %507 = vmatpush.msra.mxu0 %v1322_v12 }
  0x4d   :  { %457 = vmatpush.msra.mxu2 %v1447_v47  ;;  %531 = vmatpush.msra.mxu1 %v1355_v22 }
  0x4e   :  { %477 = vmatpush.msra.mxu3 %v1449_v48  ;;  %508 = vmatpush.msra.mxu0 %v1329_v14 }
  0x4f   :  { %458 = vmatpush.msra.mxu2 %v1455_v49  ;;  %532 = vmatpush.msra.mxu1 %v1362_v24 }
  0x50   :  { %478 = vmatpush.msra.mxu3 %v1457_v50  ;;  %509 = vmatpush.msra.mxu0 %v1336_v16 }
  0x51   :  { %459 = vmatpush.msra.mxu2 %v1466_v52  ;;  %533 = vmatpush.msra.mxu1 %v1369_v26 }
  0x52   :  { %479 = vmatpush.msra.mxu3 %v1468_v53  ;;  %510 = vmatpush.msra.mxu0 %v1346_v19 }
  0x53   :  { %460 = vmatpush.msra.mxu2 %v1474_v54  ;;  %534 = vmatpush.msra.mxu1 %v1379_v29 }
  0x54   :  { %480 = vmatpush.msra.mxu3 %v1476_v55  ;;  %511 = vmatpush.msra.mxu0 %v1353_v21 }
  0x55   :  { %461 = vmatpush.msra.mxu2 %v1482_v56  ;;  %535 = vmatpush.msra.mxu1 %v1386_v31 }
  0x56   :  { %481 = vmatpush.msra.mxu3 %v1484_v57  ;;  %512 = vmatpush.msra.mxu0 %v2172_v41 }
  0x57   :  { %462 = vmatpush.msra.mxu2 %v1490_v58  ;;  %536 = vmatpush.msra.mxu1 %v2173_v44  ;;  %v79_v44 = vld [vmem:[%s2103_s0 + $0x10] sm:$0xff] }
  0x58   :  { %482 = vmatpush.msra.mxu3 %v1492_v59  ;;  %513 = vmatpush.msra.mxu0 %v1367_v25 }
  0x59   :  { %463 = vmatpush.msra.mxu2 %v1501_v61  ;;  %537 = vmatpush.msra.mxu1 %v2174_v37  ;;  %v78_v37 = vld [vmem:[%s2103_s0 + $0x8] sm:$0xff] }
  0x5a   :  { %483 = vmatpush.msra.mxu3 %v1503_v62  ;;  %514 = vmatpush.msra.mxu0 %v1377_v28 }
  0x5b   :  { %464 = vmatpush.msra.mxu2 %v1509_v63  ;;  %1061 = vmatmul.msk.f32.gmra.mxu0 %vm98_vm1, %v78_v37  ;;  %v80_v37 = vld [vmem:[%s2103_s0 + $0x18] sm:$0xff] }
  0x5c   :  { %484 = vmatpush.msra.mxu3 %v1511_v8  ;;  %515 = vmatpush.msra.mxu0 %v1384_v30 }
  0x5d   :  { %465 = vmatpush.msra.mxu2 %v1517_v9 }
  0x5e   :  { %485 = vmatpush.msra.mxu3 %v1519_v18  ;;  %516 = vmatpush.msra.mxu0 %v1391_v32 }
  0x5f   :  { %466 = vmatpush.msra.mxu2 %v1525_v27 }
  0x60   :  { %486 = vmatpush.msra.mxu3 %v1527_v34  ;;  %517 = vmatpush.msra.mxu0 %v1401_v35 }
  0x61   :  { %467 = vmatpush.msra.mxu2 %v1536_v40 }
  0x62   :  { %487 = vmatpush.msra.mxu3 %v1538_v51 }
  0x63   :  { %468 = vmatpush.msra.mxu2 %v1544_v60  ;;  %1062 = vmatmul.msk.f32.gmra.mxu0 %vm98_vm1, %v79_v44  ;;  %v81_v44 = vld [vmem:[%s2103_s0 + $0x20] sm:$0xff] }
  0x64   :  { %488 = vmatpush.msra.mxu3 %v1546_v36 }
  0x65   :  { %469 = vmatpush.msra.mxu2 %v1552_v33 }
  0x66   :  { %489 = vmatpush.msra.mxu3 %v1554_v23 }
  0x67   :  { %542 = vmatpush.msrb.mxu2 %v1412_v38 }
  0x68   :  { %562 = vmatpush.msrb.mxu3 %v1414_v39 }
  0x69   :  { %543 = vmatpush.msrb.mxu2 %v1428_v42 }
  0x6a   :  { %563 = vmatpush.msrb.mxu3 %v1430_v43 }
  0x6b   :  { %544 = vmatpush.msrb.mxu2 %v1439_v45  ;;  %1063 = vmatmul.msk.f32.gmra.mxu0 %vm98_vm1, %v80_v37  ;;  %v1083_v37 = vld [vmem:[%s2108_s5] ss:$0 sm:$0xff] }
  0x6c   :  { %564 = vmatpush.msrb.mxu3 %v1441_v46 }
  0x6d   :  { %545 = vmatpush.msrb.mxu2 %v1447_v47 }
  0x6e   :  { %565 = vmatpush.msrb.mxu3 %v1449_v48 }
  0x6f   :  { %546 = vmatpush.msrb.mxu2 %v1455_v49 }
  0x70   :  { %566 = vmatpush.msrb.mxu3 %v1457_v50 }
  0x71   :  { %547 = vmatpush.msrb.mxu2 %v1466_v52 }
  0x72   :  { %567 = vmatpush.msrb.mxu3 %v1468_v53 }
  0x73   :  { %548 = vmatpush.msrb.mxu2 %v1474_v54  ;;  %1064 = vmatmul.msk.f32.gmra.mxu0 %vm98_vm1, %v81_v44  ;;  %v83_v44 = vld [vmem:[%s2103_s0 + $0x30] sm:$0xff] }
  0x74   :  { %568 = vmatpush.msrb.mxu3 %v1476_v55 }
  0x75   :  { %549 = vmatpush.msrb.mxu2 %v1482_v56 }
  0x76   :  { %569 = vmatpush.msrb.mxu3 %v1484_v57 }
  0x77   :  { %550 = vmatpush.msrb.mxu2 %v1490_v58 }
  0x78   :  { %570 = vmatpush.msrb.mxu3 %v1492_v59 }
  0x79   :  { %551 = vmatpush.msrb.mxu2 %v1501_v61 }
  0x7a   :  { %571 = vmatpush.msrb.mxu3 %v1503_v62 }
  0x7b   :  { %552 = vmatpush.msrb.mxu2 %v1509_v63 }
  0x7c   :  { %572 = vmatpush.msrb.mxu3 %v1511_v8 }
  0x7d   :  { %553 = vmatpush.msrb.mxu2 %v1517_v9 }
  0x7e   :  { %573 = vmatpush.msrb.mxu3 %v1519_v18 }
  0x7f   :  { %554 = vmatpush.msrb.mxu2 %v1525_v27 }
  0x80   :  { %574 = vmatpush.msrb.mxu3 %v1527_v34 }
  0x81   :  { %555 = vmatpush.msrb.mxu2 %v1536_v40 }
  0x82   :  { %575 = vmatpush.msrb.mxu3 %v1538_v51 }
  0x83   :  { %556 = vmatpush.msrb.mxu2 %v1544_v60 }
  0x84   :  { %576 = vmatpush.msrb.mxu3 %v1546_v36  ;;  %v82_v36 = vld [vmem:[%s2103_s0 + $0x28] sm:$0xff] }
  0x85   :  { %557 = vmatpush.msrb.mxu2 %v1552_v33  ;;  %1065 = vmatmul.msk.f32.gmra.mxu0 %vm98_vm1, %v82_v36 }
  0x86   :  { %577 = vmatpush.msrb.mxu3 %v1554_v23 }
  0x89   :  { %v225_v31 = vpop.f32.mrf.mxu1 }
  0x8a   :  { %v1684_v51 = vadd.f32 %v1083_v37, %v225_v31  ;;  %v84_v31 = vld [vmem:[%s2103_s0 + $0x38] sm:$0xff]  ;;  %s1236_s0 = smov [#allocation8]  }
  0x8c   :  { %2175 = vst [vmem:[#allocation12_spill] sm:$0xff] %v1684_v51 }
  0x8d   :  { %1066 = vmatmul.msk.f32.gmra.mxu0 %vm98_vm1, %v83_v44 }
  0x91   :  { %v228_v23 = vpop.f32.mrf.mxu1 }
  0x92   :  { %v1690_v34 = vadd.f32 %v1083_v37, %v228_v23  ;;  %v1707_v23 = vld [vmem:[%s2106_s3] ss:$0 sm:$0xff]  ;;  %s1037_s3 = sshll.u32 %s1236_s0, 4  ;;  %s1038_s3 = int_to_ptr.vmem [resolvable:$true] %s1037_s3 }
  0x94   :  { %2176 = vst [vmem:[#allocation31_spill] sm:$0xff] %v1690_v34 }
  0x95   :  { %1067 = vmatmul.msk.f32.gmra.mxu0 %vm98_vm1, %v84_v31 }
  0x97   :  { %v144_v34 = vpop.f32.mrf.mxu0 }
  0x98   :  { %v145_v44 = vadd.f32 %v1707_v23, %v144_v34 }
  0x99   :  { %v231_v29 = vpop.f32.mrf.mxu1 }
  0x9a   :  { %v1696_v18 = vadd.f32 %v1083_v37, %v231_v29 }
  0x9c   :  { %2177 = vst [vmem:[#allocation32_spill] sm:$0xff] %v1696_v18 }
  0xa1   :  { %v234_v51 = vpop.f32.mrf.mxu1 }
  0xa2   :  { %v1702_v36 = vadd.f32 %v1083_v37, %v234_v51 }
  0xa4   :  { %2178 = vst [vmem:[#allocation33_spill] sm:$0xff] %v1702_v36  ;;  %v2190_v36 = vld [vmem:[#allocation26_spill] sm:$0xff] }
  0xa9   :  { %v343_v26 = vpop.f32.mrf.mxu2  ;;  %v237_v29 = vpop.f32.mrf.mxu1 }
  0xaa   :  { %v363_v18 = vpop.f32.mrf.mxu3  ;;  %v1710_v8 = vadd.f32 %v1083_v37, %v237_v29 }
  0xab   :  { %v364_v24 = vadd.f32 %v363_v18, %v343_v26 }
  0xac   :  { %2179 = vst [vmem:[#allocation34_spill] sm:$0xff] %v1710_v8  ;;  %v2191_v8 = vld [vmem:[#allocation18_spill] sm:$0xff] }
  0xad   :  { %v406_v62 = vadd.f32 %v364_v24, %v145_v44 }
  0xaf   :  { %1085 = vtanh.f32 %v406_v62 }
  0xb1   :  { %v240_v31 = vpop.f32.mrf.mxu1 }
  0xb2   :  { %v1712_v22 = vadd.f32 %v1083_v37, %v240_v31 }
  0xb4   :  { %2180 = vst [vmem:[#allocation35_spill] sm:$0xff] %v1712_v22  ;;  %v2192_v22 = vld [vmem:[#allocation28_spill] sm:$0xff] }
  0xb5   :  { %v1086_v51 = vpop.eup %1085 }
  0xb6   :  { %430 = vmatmul.f32.vlgmr.msrb.gmra.mxu0 %v1086_v51  ;;  %470 = vmatmul.f32.vlgmr.msra.gmra.mxu2 %v1086_v51  ;;  %v2181_v51 = vld [vmem:[#allocation11_spill] sm:$0xff] }
  0xb7   :  { %590 = vmatpush.msrb.mxu0 %v1287_v0  ;;  %630 = vmatpush.msra.mxu2 %v1412_v38 }
  0xb9   :  { %591 = vmatpush.msrb.mxu0 %v1291_v2  ;;  %631 = vmatpush.msra.mxu2 %v1428_v42  ;;  %v243_v34 = vpop.f32.mrf.mxu1 }
  0xba   :  { %v1718_v29 = vadd.f32 %v1083_v37, %v243_v34  ;;  %v2182_v34 = vld [vmem:[#allocation21_spill] sm:$0xff] }
  0xbb   :  { %592 = vmatpush.msrb.mxu0 %v1297_v4  ;;  %632 = vmatpush.msra.mxu2 %v1439_v45 }
  0xbd   :  { %593 = vmatpush.msrb.mxu0 %v1303_v6  ;;  %633 = vmatpush.msra.mxu2 %v1447_v47 }
  0xbf   :  { %594 = vmatpush.msrb.mxu0 %v1315_v10  ;;  %634 = vmatpush.msra.mxu2 %v1455_v49 }
  0xc1   :  { %595 = vmatpush.msrb.mxu0 %v1322_v12  ;;  %635 = vmatpush.msra.mxu2 %v1466_v52  ;;  %v246_v24 = vpop.f32.mrf.mxu1 }
  0xc2   :  { %v247_v26 = vadd.f32 %v1083_v37, %v246_v24  ;;  %v2183_v24 = vld [vmem:[#allocation13_spill] sm:$0xff] }
  0xc3   :  { %596 = vmatpush.msrb.mxu0 %v1329_v14  ;;  %636 = vmatpush.msra.mxu2 %v1474_v54 }
  0xc5   :  { %597 = vmatpush.msrb.mxu0 %v1336_v16  ;;  %637 = vmatpush.msra.mxu2 %v1482_v56 }
  0xc7   :  { %598 = vmatpush.msrb.mxu0 %v1346_v19  ;;  %638 = vmatpush.msra.mxu2 %v1490_v58 }
  0xc9   :  { %v383_v62 = vpop.f32.mrf.mxu2  ;;  %599 = vmatpush.msrb.mxu0 %v1353_v21  ;;  %639 = vmatpush.msra.mxu2 %v1501_v61 }
  0xca   :  { %v403_v18 = vpop.f32.mrf.mxu3 }
  0xcb   :  { %v404_v44 = vadd.f32 %v403_v18, %v383_v62  ;;  %600 = vmatpush.msrb.mxu0 %v2172_v41  ;;  %640 = vmatpush.msra.mxu2 %v1509_v63  ;;  %v2185_v62 = vld [vmem:[#allocation14_spill] sm:$0xff]  ;;  %v2186_v18 = vld [vmem:[#allocation23_spill] sm:$0xff] }
  0xcd   :  { %v407_v31 = vadd.f32 %v404_v44, %v247_v26  ;;  %601 = vmatpush.msrb.mxu0 %v1367_v25  ;;  %641 = vmatpush.msra.mxu2 %v1517_v9  ;;  %v2184_v26 = vld [vmem:[#allocation22_spill] sm:$0xff]  ;;  %v2187_v44 = vld [vmem:[#allocation15_spill] sm:$0xff] }
  0xcf   :  { %1087 = vtanh.f32 %v407_v31  ;;  %602 = vmatpush.msrb.mxu0 %v1377_v28  ;;  %642 = vmatpush.msra.mxu2 %v1525_v27  ;;  %v2188_v31 = vld [vmem:[#allocation24_spill] sm:$0xff] }
  0xd1   :  { %603 = vmatpush.msrb.mxu0 %v1384_v30  ;;  %643 = vmatpush.msra.mxu2 %v1536_v40 }
  0xd3   :  { %604 = vmatpush.msrb.mxu0 %v1391_v32  ;;  %644 = vmatpush.msra.mxu2 %v1544_v60 }
  0xd5   :  { %v1088_v37 = vpop.eup %1087  ;;  %605 = vmatpush.msrb.mxu0 %v1401_v35  ;;  %645 = vmatpush.msra.mxu2 %v1552_v33  ;;  %v2193_v33 = vld [vmem:[#allocation20_spill] sm:$0xff]  ;;  %v2194_v35 = vld [vmem:[#allocation30_spill] sm:$0xff] }
  0xd6   :  { %450 = vmatmul.f32.vlgmr.msrb.gmra.mxu1 %v1088_v37  ;;  %490 = vmatmul.f32.vlgmr.msra.gmra.mxu3 %v1088_v37  ;;  %v2189_v37 = vld [vmem:[#allocation16_spill] sm:$0xff] }
  0xd7   :  { %610 = vmatpush.msrb.mxu1 %v1289_v1  ;;  %650 = vmatpush.msra.mxu3 %v1414_v39 }
  0xd8   :  { %v147_v60 = vpop.f32.mrf.mxu0 }
  0xd9   :  { %611 = vmatpush.msrb.mxu1 %v1295_v3  ;;  %651 = vmatpush.msra.mxu3 %v1430_v43 }
  0xdb   :  { %612 = vmatpush.msrb.mxu1 %v1299_v5  ;;  %652 = vmatpush.msra.mxu3 %v1441_v46 }
  0xdd   :  { %613 = vmatpush.msrb.mxu1 %v1305_v7  ;;  %653 = vmatpush.msra.mxu3 %v1449_v48 }
  0xdf   :  { %614 = vmatpush.msrb.mxu1 %v1317_v11  ;;  %654 = vmatpush.msra.mxu3 %v1457_v50 }
  0xe1   :  { %615 = vmatpush.msrb.mxu1 %v1324_v13  ;;  %655 = vmatpush.msra.mxu3 %v1468_v53 }
  0xe3   :  { %616 = vmatpush.msrb.mxu1 %v1331_v15  ;;  %656 = vmatpush.msra.mxu3 %v1476_v55 }
  0xe5   :  { %617 = vmatpush.msrb.mxu1 %v1338_v17  ;;  %657 = vmatpush.msra.mxu3 %v1484_v57 }
  0xe7   :  { %618 = vmatpush.msrb.mxu1 %v1348_v20  ;;  %658 = vmatpush.msra.mxu3 %v1492_v59 }
  0xe9   :  { %619 = vmatpush.msrb.mxu1 %v2181_v51  ;;  %659 = vmatpush.msra.mxu3 %v2182_v34 }
  0xeb   :  { %620 = vmatpush.msrb.mxu1 %v2183_v24  ;;  %660 = vmatpush.msra.mxu3 %v2184_v26 }
  0xed   :  { %621 = vmatpush.msrb.mxu1 %v2185_v62  ;;  %661 = vmatpush.msra.mxu3 %v2186_v18  ;;  %v1780_v62 = vpop.f32.mrf.mxu0 }
  0xee   :  { %2195 = vst [vmem:[#allocation11_spill] sm:$0xff] %v1780_v62 }
  0xef   :  { %622 = vmatpush.msrb.mxu1 %v2187_v44  ;;  %662 = vmatpush.msra.mxu3 %v2188_v31 }
  0xf1   :  { %623 = vmatpush.msrb.mxu1 %v2189_v37  ;;  %663 = vmatpush.msra.mxu3 %v2190_v36 }
  0xf3   :  { %624 = vmatpush.msrb.mxu1 %v2191_v8  ;;  %664 = vmatpush.msra.mxu3 %v2192_v22  ;;  %v148_v22 = vadd.f32 %v1707_v23, %v147_v60  ;;  %v2210_v60 = vld [vmem:[#allocation29_spill] sm:$0xff] }
  0xf5   :  { %625 = vmatpush.msrb.mxu1 %v2193_v33  ;;  %665 = vmatpush.msra.mxu3 %v2194_v35  ;;  %v1782_v18 = vpop.f32.mrf.mxu0 }
  0xf6   :  { %2196 = vst [vmem:[#allocation21_spill] sm:$0xff] %v1782_v18 }
  0xfd   :  { %v1784_v44 = vpop.f32.mrf.mxu0 }
  0xfe   :  { %2197 = vst [vmem:[#allocation36_spill] sm:$0xff] %v1784_v44  ;;  %v2218_v44 = vld [vmem:[#allocation11_spill] sm:$0xff] }
 0x105   :  { %v1786_v31 = vpop.f32.mrf.mxu0 }
 0x106   :  { %2198 = vst [vmem:[#allocation37_spill] sm:$0xff] %v1786_v31 }
 0x10d   :  { %v1788_v37 = vpop.f32.mrf.mxu0 }
 0x10e   :  { %2199 = vst [vmem:[#allocation38_spill] sm:$0xff] %v1788_v37 }
 0x115   :  { %v1790_v36 = vpop.f32.mrf.mxu0 }
 0x116   :  { %2200 = vst [vmem:[#allocation39_spill] sm:$0xff] %v1790_v36  ;;  %v2217_v36 = vld [vmem:[#allocation30_spill] sm:$0xff] }
 0x133   :  { %v431_v8 = vpop.f32.mrf.mxu0 }
 0x139   :  { %v471_v35 = vpop.f32.mrf.mxu2 }
 0x153   :  { %v451_v32 = vpop.f32.mrf.mxu1 }
 0x154   :  { %v452_v33 = vadd.f32 %v451_v32, %v431_v8  ;;  %v2208_v8 = vld [vmem:[#allocation19_spill] sm:$0xff] }
 0x156   :  { %v494_v26 = vadd.f32 %v452_v33, %v148_v22  ;;  %v2205_v22 = vld [vmem:[#allocation14_spill] sm:$0xff]  ;;  %v2206_v33 = vld [vmem:[#allocation27_spill] sm:$0xff] }
 0x158   :  { %1089 = vtanh.f32 %v494_v26  ;;  %v2213_v26 = vld [vmem:[#allocation26_spill] sm:$0xff] }
 0x159   :  { %v491_v40 = vpop.f32.mrf.mxu3 }
 0x15a   :  { %v492_v62 = vadd.f32 %v491_v40, %v471_v35  ;;  %v2207_v35 = vld [vmem:[#allocation23_spill] sm:$0xff] }
 0x15b   :  { %v2209_v40 = vld [vmem:[#allocation15_spill] sm:$0xff] }
 0x15c   :  { %v495_v18 = vadd.f32 %v492_v62, %v1718_v29  ;;  %v2211_v29 = vld [vmem:[#allocation24_spill] sm:$0xff]  ;;  %v2214_v62 = vld [vmem:[#allocation18_spill] sm:$0xff] }
 0x15e   :  { %v1090_v24 = vpop.eup %1089  ;;  %1091 = vtanh.f32 %v495_v18  ;;  %v2215_v18 = vld [vmem:[#allocation28_spill] sm:$0xff] }
 0x15f   :  { %518 = vmatmul.f32.vlgmr.msra.gmra.mxu0 %v1090_v24  ;;  %558 = vmatmul.f32.vlgmr.msrb.gmra.mxu2 %v1090_v24  ;;  %v2212_v24 = vld [vmem:[#allocation16_spill] sm:$0xff] }
 0x160   :  { %678 = vmatpush.msra.mxu0 %v1287_v0  ;;  %718 = vmatpush.msrb.mxu2 %v1412_v38 }
 0x162   :  { %679 = vmatpush.msra.mxu0 %v1291_v2  ;;  %719 = vmatpush.msrb.mxu2 %v1428_v42 }
 0x164   :  { %v1092_v32 = vpop.eup %1091  ;;  %680 = vmatpush.msra.mxu0 %v1297_v4  ;;  %720 = vmatpush.msrb.mxu2 %v1439_v45 }
 0x165   :  { %538 = vmatmul.f32.vlgmr.msra.gmra.mxu1 %v1092_v32  ;;  %578 = vmatmul.f32.vlgmr.msrb.gmra.mxu3 %v1092_v32  ;;  %v2216_v32 = vld [vmem:[#allocation20_spill] sm:$0xff] }
 0x166   :  { %681 = vmatpush.msra.mxu0 %v1303_v6  ;;  %698 = vmatpush.msra.mxu1 %v1289_v1  ;;  %v2201_v1 = vld [vmem:[#allocation13_spill] sm:$0xff] }
 0x167   :  { %721 = vmatpush.msrb.mxu2 %v1447_v47  ;;  %738 = vmatpush.msrb.mxu3 %v1414_v39 }
 0x168   :  { %682 = vmatpush.msra.mxu0 %v1315_v10  ;;  %699 = vmatpush.msra.mxu1 %v1295_v3  ;;  %v2202_v3 = vld [vmem:[#allocation25_spill] sm:$0xff] }
 0x169   :  { %722 = vmatpush.msrb.mxu2 %v1455_v49  ;;  %739 = vmatpush.msrb.mxu3 %v1430_v43 }
 0x16a   :  { %683 = vmatpush.msra.mxu0 %v1322_v12  ;;  %700 = vmatpush.msra.mxu1 %v1299_v5  ;;  %v2203_v5 = vld [vmem:[#allocation22_spill] sm:$0xff] }
 0x16b   :  { %723 = vmatpush.msrb.mxu2 %v1466_v52  ;;  %740 = vmatpush.msrb.mxu3 %v1441_v46 }
 0x16c   :  { %684 = vmatpush.msra.mxu0 %v1329_v14  ;;  %701 = vmatpush.msra.mxu1 %v1305_v7  ;;  %v2204_v7 = vld [vmem:[#allocation17_spill] sm:$0xff] }
 0x16d   :  { %724 = vmatpush.msrb.mxu2 %v1474_v54  ;;  %741 = vmatpush.msrb.mxu3 %v1449_v48 }
 0x16e   :  { %685 = vmatpush.msra.mxu0 %v1336_v16  ;;  %702 = vmatpush.msra.mxu1 %v1317_v11 }
 0x16f   :  { %725 = vmatpush.msrb.mxu2 %v1482_v56  ;;  %742 = vmatpush.msrb.mxu3 %v1457_v50 }
 0x170   :  { %686 = vmatpush.msra.mxu0 %v1346_v19  ;;  %703 = vmatpush.msra.mxu1 %v1324_v13 }
 0x171   :  { %726 = vmatpush.msrb.mxu2 %v1490_v58  ;;  %743 = vmatpush.msrb.mxu3 %v1468_v53 }
 0x172   :  { %687 = vmatpush.msra.mxu0 %v1353_v21  ;;  %704 = vmatpush.msra.mxu1 %v1331_v15 }
 0x173   :  { %727 = vmatpush.msrb.mxu2 %v1501_v61  ;;  %744 = vmatpush.msrb.mxu3 %v1476_v55 }
 0x174   :  { %688 = vmatpush.msra.mxu0 %v2172_v41  ;;  %705 = vmatpush.msra.mxu1 %v1338_v17 }
 0x175   :  { %728 = vmatpush.msrb.mxu2 %v1509_v63  ;;  %745 = vmatpush.msrb.mxu3 %v1484_v57 }
 0x176   :  { %689 = vmatpush.msra.mxu0 %v1367_v25  ;;  %706 = vmatpush.msra.mxu1 %v1348_v20 }
 0x177   :  { %729 = vmatpush.msrb.mxu2 %v1517_v9  ;;  %746 = vmatpush.msrb.mxu3 %v1492_v59 }
 0x178   :  { %690 = vmatpush.msra.mxu0 %v1377_v28  ;;  %707 = vmatpush.msra.mxu1 %v2181_v51 }
 0x179   :  { %730 = vmatpush.msrb.mxu2 %v1525_v27  ;;  %747 = vmatpush.msrb.mxu3 %v2182_v34 }
 0x17a   :  { %691 = vmatpush.msra.mxu0 %v1384_v30  ;;  %708 = vmatpush.msra.mxu1 %v2201_v1 }
 0x17b   :  { %731 = vmatpush.msrb.mxu2 %v2202_v3  ;;  %748 = vmatpush.msrb.mxu3 %v2203_v5 }
 0x17c   :  { %692 = vmatpush.msra.mxu0 %v2204_v7  ;;  %709 = vmatpush.msra.mxu1 %v2205_v22 }
 0x17d   :  { %732 = vmatpush.msrb.mxu2 %v2206_v33  ;;  %749 = vmatpush.msrb.mxu3 %v2207_v35 }
 0x17e   :  { %693 = vmatpush.msra.mxu0 %v2208_v8  ;;  %710 = vmatpush.msra.mxu1 %v2209_v40  ;;  %v151_v40 = vadd.f32 %v1707_v23, %v2218_v44 }
 0x17f   :  { %733 = vmatpush.msrb.mxu2 %v2210_v60  ;;  %750 = vmatpush.msrb.mxu3 %v2211_v29 }
 0x180   :  { %711 = vmatpush.msra.mxu1 %v2212_v24 }
 0x181   :  { %751 = vmatpush.msrb.mxu3 %v2213_v26  ;;  %v2219_v26 = vld [vmem:[#allocation35_spill] sm:$0xff] }
 0x182   :  { %712 = vmatpush.msra.mxu1 %v2214_v62 }
 0x183   :  { %752 = vmatpush.msrb.mxu3 %v2215_v18 }
 0x184   :  { %713 = vmatpush.msra.mxu1 %v2216_v32 }
 0x185   :  { %753 = vmatpush.msrb.mxu3 %v2217_v36 }
 0x1dc   :  { %v519_v37 = vpop.f32.mrf.mxu0 }
 0x1e2   :  { %v539_v31 = vpop.f32.mrf.mxu1  ;;  %v559_v29 = vpop.f32.mrf.mxu2 }
 0x1e3   :  { %v540_v60 = vadd.f32 %v539_v31, %v519_v37  ;;  %v1868_v31 = vld [vmem:[#allocation5 + $0x1f0] sm:$0xff] }
 0x1e5   :  { %v582_v8 = vadd.f32 %v540_v60, %v151_v40  ;;  %v1944_v40 = vld [vmem:[#allocation5 + $0xd0] sm:$0xff]  ;;  %v1948_v60 = vld [vmem:[#allocation5 + $0xc0] sm:$0xff] }
 0x1e7   :  { %1093 = vtanh.f32 %v582_v8 }
 0x1e8   :  { %v579_v24 = vpop.f32.mrf.mxu3 }
 0x1e9   :  { %v580_v35 = vadd.f32 %v579_v24, %v559_v29  ;;  %v2231_v24 = vld [vmem:[#allocation36_spill] sm:$0xff] }
 0x1eb   :  { %v583_v33 = vadd.f32 %v580_v35, %v2219_v26  ;;  %v1940_v35 = vld [vmem:[#allocation5 + $0xe0] sm:$0xff]  ;;  %v157_v26 = vadd.f32 %v1707_v23, %v2231_v24 }
 0x1ed   :  { %v1094_v62 = vpop.eup %1093  ;;  %1095 = vtanh.f32 %v583_v33  ;;  %v1936_v33 = vld [vmem:[#allocation5 + $0xf0] sm:$0xff] }
 0x1ee   :  { %606 = vmatmul.f32.vlgmr.msrb.gmra.mxu0 %v1094_v62  ;;  %646 = vmatmul.f32.vlgmr.msra.gmra.mxu2 %v1094_v62 }
 0x1ef   :  { %766 = vmatpush.msrb.mxu0 %v1287_v0  ;;  %806 = vmatpush.msra.mxu2 %v1412_v38  ;;  %v1874_v0 = vld [vmem:[#allocation5 + $0x1e0] sm:$0xff] }
 0x1f1   :  { %767 = vmatpush.msrb.mxu0 %v1291_v2  ;;  %807 = vmatpush.msra.mxu2 %v1428_v42  ;;  %v1880_v2 = vld [vmem:[#allocation5 + $0x1d0] sm:$0xff] }
 0x1f3   :  { %v1096_v44 = vpop.eup %1095  ;;  %768 = vmatpush.msrb.mxu0 %v1297_v4  ;;  %808 = vmatpush.msra.mxu2 %v1439_v45  ;;  %v1886_v4 = vld [vmem:[#allocation5 + $0x1c0] sm:$0xff] }
 0x1f4   :  { %626 = vmatmul.f32.vlgmr.msrb.gmra.mxu1 %v1096_v44  ;;  %666 = vmatmul.f32.vlgmr.msra.gmra.mxu3 %v1096_v44 }
 0x1f5   :  { %769 = vmatpush.msrb.mxu0 %v1303_v6  ;;  %786 = vmatpush.msrb.mxu1 %v1868_v31  ;;  %v2220_v6 = vld [vmem:[#allocation27_spill] sm:$0xff] }
 0x1f6   :  { %809 = vmatpush.msra.mxu2 %v1447_v47  ;;  %826 = vmatpush.msra.mxu3 %v1414_v39 }
 0x1f7   :  { %770 = vmatpush.msrb.mxu0 %v1315_v10  ;;  %787 = vmatpush.msrb.mxu1 %v1874_v0  ;;  %v2221_v10 = vld [vmem:[#allocation23_spill] sm:$0xff] }
 0x1f8   :  { %810 = vmatpush.msra.mxu2 %v1455_v49  ;;  %827 = vmatpush.msra.mxu3 %v1430_v43 }
 0x1f9   :  { %771 = vmatpush.msrb.mxu0 %v1322_v12  ;;  %788 = vmatpush.msrb.mxu1 %v1880_v2  ;;  %v2223_v12 = vld [vmem:[#allocation15_spill] sm:$0xff] }
 0x1fa   :  { %811 = vmatpush.msra.mxu2 %v1466_v52  ;;  %828 = vmatpush.msra.mxu3 %v1441_v46 }
 0x1fb   :  { %772 = vmatpush.msrb.mxu0 %v1329_v14  ;;  %789 = vmatpush.msrb.mxu1 %v1886_v4  ;;  %v2225_v14 = vld [vmem:[#allocation24_spill] sm:$0xff] }
 0x1fc   :  { %812 = vmatpush.msra.mxu2 %v1474_v54  ;;  %829 = vmatpush.msra.mxu3 %v1449_v48 }
 0x1fd   :  { %773 = vmatpush.msrb.mxu0 %v1336_v16  ;;  %790 = vmatpush.msrb.mxu1 %v1317_v11  ;;  %v2222_v11 = vld [vmem:[#allocation19_spill] sm:$0xff]  ;;  %v2227_v16 = vld [vmem:[#allocation26_spill] sm:$0xff] }
 0x1fe   :  { %813 = vmatpush.msra.mxu2 %v1482_v56  ;;  %830 = vmatpush.msra.mxu3 %v1457_v50 }
 0x1ff   :  { %774 = vmatpush.msrb.mxu0 %v1346_v19  ;;  %791 = vmatpush.msrb.mxu1 %v1324_v13  ;;  %v2224_v13 = vld [vmem:[#allocation29_spill] sm:$0xff] }
 0x200   :  { %814 = vmatpush.msra.mxu2 %v1490_v58  ;;  %831 = vmatpush.msra.mxu3 %v1468_v53 }
 0x201   :  { %775 = vmatpush.msrb.mxu0 %v1353_v21  ;;  %792 = vmatpush.msrb.mxu1 %v1331_v15  ;;  %v2226_v15 = vld [vmem:[#allocation16_spill] sm:$0xff]  ;;  %v2229_v21 = vld [vmem:[#allocation21_spill] sm:$0xff] }
 0x202   :  { %815 = vmatpush.msra.mxu2 %v1501_v61  ;;  %832 = vmatpush.msra.mxu3 %v1476_v55 }
 0x203   :  { %776 = vmatpush.msrb.mxu0 %v2172_v41  ;;  %793 = vmatpush.msrb.mxu1 %v1338_v17  ;;  %v2228_v17 = vld [vmem:[#allocation18_spill] sm:$0xff] }
 0x204   :  { %816 = vmatpush.msra.mxu2 %v1509_v63  ;;  %833 = vmatpush.msra.mxu3 %v1484_v57 }
 0x205   :  { %777 = vmatpush.msrb.mxu0 %v1367_v25  ;;  %794 = vmatpush.msrb.mxu1 %v1348_v20  ;;  %v154_v25 = vadd.f32 %v1707_v23, %v2229_v21  ;;  %v1156_v21 = vld [vmem:[#allocation5 + $0xa8] sm:$0xff] }
 0x206   :  { %817 = vmatpush.msra.mxu2 %v1517_v9  ;;  %834 = vmatpush.msra.mxu3 %v1492_v59 }
 0x207   :  { %778 = vmatpush.msrb.mxu0 %v1377_v28  ;;  %795 = vmatpush.msrb.mxu1 %v2181_v51 }
 0x208   :  { %818 = vmatpush.msra.mxu2 %v1525_v27  ;;  %835 = vmatpush.msra.mxu3 %v2182_v34 }
 0x209   :  { %779 = vmatpush.msrb.mxu0 %v1384_v30  ;;  %796 = vmatpush.msrb.mxu1 %v2201_v1  ;;  %v2230_v1 = vld [vmem:[#allocation34_spill] sm:$0xff] }
 0x20a   :  { %819 = vmatpush.msra.mxu2 %v2202_v3  ;;  %836 = vmatpush.msra.mxu3 %v2203_v5 }
 0x20b   :  { %780 = vmatpush.msrb.mxu0 %v2204_v7  ;;  %797 = vmatpush.msrb.mxu1 %v2205_v22 }
 0x20c   :  { %820 = vmatpush.msra.mxu2 %v2220_v6  ;;  %837 = vmatpush.msra.mxu3 %v2221_v10 }
 0x20d   :  { %781 = vmatpush.msrb.mxu0 %v2222_v11  ;;  %798 = vmatpush.msrb.mxu1 %v2223_v12  ;;  %v2232_v11 = vld [vmem:[#allocation33_spill] sm:$0xff] }
 0x20e   :  { %821 = vmatpush.msra.mxu2 %v2224_v13  ;;  %838 = vmatpush.msra.mxu3 %v2225_v14 }
 0x20f   :  { %799 = vmatpush.msrb.mxu1 %v2226_v15  ;;  %v1151_v15 = vld [vmem:[#allocation5 + $0xd8] sm:$0xff] }
 0x210   :  { %839 = vmatpush.msra.mxu3 %v2227_v16 }
 0x211   :  { %800 = vmatpush.msrb.mxu1 %v2228_v17  ;;  %v1153_v17 = vld [vmem:[#allocation5 + $0x1f8] sm:$0xff] }
 0x212   :  { %840 = vmatpush.msra.mxu3 %v2215_v18 }
 0x213   :  { %801 = vmatpush.msrb.mxu1 %v2216_v32 }
 0x214   :  { %841 = vmatpush.msra.mxu3 %v2217_v36 }
 0x26b   :  { %v607_v19 = vpop.f32.mrf.mxu0 }
 0x271   :  { %v627_v20 = vpop.f32.mrf.mxu1  ;;  %v647_v41 = vpop.f32.mrf.mxu2 }
 0x272   :  { %v628_v28 = vadd.f32 %v627_v20, %v607_v19  ;;  %v1154_v19 = vld [vmem:[#allocation5 + $0xb8] sm:$0xff]  ;;  %v1155_v20 = vld [vmem:[#allocation5 + $0x1e8] sm:$0xff] }
 0x274   :  { %v670_v30 = vadd.f32 %v628_v28, %v154_v25  ;;  %v1157_v25 = vld [vmem:[#allocation5 + $0x1d8] sm:$0xff]  ;;  %v1159_v28 = vld [vmem:[#allocation5 + $0x1c8] sm:$0xff] }
 0x276   :  { %1097 = vtanh.f32 %v670_v30  ;;  %v1161_v30 = vld [vmem:[#allocation5 + $0x1b8] sm:$0xff] }
 0x277   :  { %v667_v51 = vpop.f32.mrf.mxu3 }
 0x278   :  { %v668_v37 = vadd.f32 %v667_v51, %v647_v41  ;;  %v1163_v41 = vld [vmem:[#allocation5 + $0x1a8] sm:$0xff]  ;;  %v1165_v51 = vld [vmem:[#allocation5 + $0x198] sm:$0xff] }
 0x27a   :  { %v671_v7 = vadd.f32 %v668_v37, %v2230_v1  ;;  %v1166_v37 = vld [vmem:[#allocation5 + $0x58] sm:$0xff]  ;;  %v1167_v1 = vld [vmem:[#allocation5 + $0x188] sm:$0xff] }
 0x27c   :  { %v1098_v22 = vpop.eup %1097  ;;  %1099 = vtanh.f32 %v671_v7  ;;  %v1168_v7 = vld [vmem:[#allocation5 + $0x48] sm:$0xff] }
 0x27d   :  { %694 = vmatmul.f32.vlgmr.msra.gmra.mxu0 %v1098_v22  ;;  %734 = vmatmul.f32.vlgmr.msrb.gmra.mxu2 %v1098_v22  ;;  %v1169_v22 = vld [vmem:[#allocation5 + $0x178] sm:$0xff] }
 0x27e   :  { %854 = vmatpush.msra.mxu0 %v1936_v33  ;;  %894 = vmatpush.msrb.mxu2 %v1412_v38  ;;  %v1954_v38 = vld [vmem:[#allocation5 + $0xb0] sm:$0xff] }
 0x280   :  { %855 = vmatpush.msra.mxu0 %v1940_v35  ;;  %895 = vmatpush.msrb.mxu2 %v1428_v42  ;;  %v1960_v42 = vld [vmem:[#allocation5 + $0xa0] sm:$0xff] }
 0x282   :  { %v1100_v8 = vpop.eup %1099  ;;  %856 = vmatpush.msra.mxu0 %v1944_v40  ;;  %896 = vmatpush.msrb.mxu2 %v1439_v45  ;;  %v1975_v45 = vld [vmem:[#allocation5 + $0x1b0] sm:$0xff] }
 0x283   :  { %714 = vmatmul.f32.vlgmr.msra.gmra.mxu1 %v1100_v8  ;;  %754 = vmatmul.f32.vlgmr.msrb.gmra.mxu3 %v1100_v8  ;;  %v1172_v8 = vld [vmem:[#allocation5 + $0x28] sm:$0xff] }
 0x284   :  { %857 = vmatpush.msra.mxu0 %v1948_v60  ;;  %874 = vmatpush.msra.mxu1 %v1868_v31 }
 0x285   :  { %897 = vmatpush.msrb.mxu2 %v1447_v47  ;;  %914 = vmatpush.msrb.mxu3 %v1414_v39  ;;  %v1966_v39 = vld [vmem:[#allocation5 + $0x90] sm:$0xff]  ;;  %v1983_v47 = vld [vmem:[#allocation5 + $0x1a0] sm:$0xff] }
 0x286   :  { %858 = vmatpush.msra.mxu0 %v1954_v38  ;;  %875 = vmatpush.msra.mxu1 %v1874_v0 }
 0x287   :  { %898 = vmatpush.msrb.mxu2 %v1455_v49  ;;  %915 = vmatpush.msrb.mxu3 %v1430_v43  ;;  %v1972_v43 = vld [vmem:[#allocation5 + $0x80] sm:$0xff]  ;;  %v1991_v49 = vld [vmem:[#allocation5 + $0x190] sm:$0xff] }
 0x288   :  { %859 = vmatpush.msra.mxu0 %v1960_v42  ;;  %876 = vmatpush.msra.mxu1 %v1880_v2 }
 0x289   :  { %899 = vmatpush.msrb.mxu2 %v1466_v52  ;;  %916 = vmatpush.msrb.mxu3 %v1441_v46  ;;  %v1980_v46 = vld [vmem:[#allocation5 + $0x70] sm:$0xff]  ;;  %v1999_v52 = vld [vmem:[#allocation5 + $0x180] sm:$0xff] }
 0x28a   :  { %860 = vmatpush.msra.mxu0 %v1966_v39  ;;  %877 = vmatpush.msra.mxu1 %v1886_v4 }
 0x28b   :  { %900 = vmatpush.msrb.mxu2 %v1474_v54  ;;  %917 = vmatpush.msrb.mxu3 %v1449_v48  ;;  %v1988_v48 = vld [vmem:[#allocation5 + $0x60] sm:$0xff]  ;;  %v2007_v54 = vld [vmem:[#allocation5 + $0x170] sm:$0xff] }
 0x28c   :  { %861 = vmatpush.msra.mxu0 %v1972_v43  ;;  %878 = vmatpush.msra.mxu1 %v1975_v45 }
 0x28d   :  { %901 = vmatpush.msrb.mxu2 %v1482_v56  ;;  %918 = vmatpush.msrb.mxu3 %v1457_v50  ;;  %v1996_v50 = vld [vmem:[#allocation5 + $0x50] sm:$0xff]  ;;  %v2015_v56 = vld [vmem:[#allocation5 + $0x160] sm:$0xff] }
 0x28e   :  { %862 = vmatpush.msra.mxu0 %v1980_v46  ;;  %879 = vmatpush.msra.mxu1 %v1983_v47 }
 0x28f   :  { %902 = vmatpush.msrb.mxu2 %v1490_v58  ;;  %919 = vmatpush.msrb.mxu3 %v1468_v53  ;;  %v2004_v53 = vld [vmem:[#allocation5 + $0x40] sm:$0xff]  ;;  %v2023_v58 = vld [vmem:[#allocation5 + $0x150] sm:$0xff] }
 0x290   :  { %863 = vmatpush.msra.mxu0 %v1988_v48  ;;  %880 = vmatpush.msra.mxu1 %v1991_v49 }
 0x291   :  { %903 = vmatpush.msrb.mxu2 %v1501_v61  ;;  %920 = vmatpush.msrb.mxu3 %v1476_v55  ;;  %v2012_v55 = vld [vmem:[#allocation5 + $0x30] sm:$0xff]  ;;  %v2031_v61 = vld [vmem:[#allocation5 + $0x140] sm:$0xff] }
 0x292   :  { %864 = vmatpush.msra.mxu0 %v1996_v50  ;;  %881 = vmatpush.msra.mxu1 %v1999_v52 }
 0x293   :  { %904 = vmatpush.msrb.mxu2 %v1509_v63  ;;  %921 = vmatpush.msrb.mxu3 %v1484_v57  ;;  %v2020_v57 = vld [vmem:[#allocation5 + $0x20] sm:$0xff] }
 0x294   :  { %865 = vmatpush.msra.mxu0 %v2004_v53  ;;  %882 = vmatpush.msra.mxu1 %v2007_v54  ;;  %v2036_v63 = vld [vmem:[#allocation5] sm:$0xff] }
 0x295   :  { %905 = vmatpush.msrb.mxu2 %v1517_v9  ;;  %922 = vmatpush.msrb.mxu3 %v1492_v59  ;;  %v2028_v59 = vld [vmem:[#allocation5 + $0x10] sm:$0xff] }
 0x296   :  { %866 = vmatpush.msra.mxu0 %v2012_v55  ;;  %883 = vmatpush.msra.mxu1 %v2015_v56  ;;  %v2039_v9 = vld [vmem:[#allocation5 + $0x130] sm:$0xff] }
 0x297   :  { %906 = vmatpush.msrb.mxu2 %v1525_v27  ;;  %923 = vmatpush.msrb.mxu3 %v2182_v34  ;;  %v2044_v27 = vld [vmem:[#allocation5 + $0x120] sm:$0xff]  ;;  %v2048_v34 = vld [vmem:[#allocation5 + $0x110] sm:$0xff] }
 0x298   :  { %867 = vmatpush.msra.mxu0 %v2020_v57  ;;  %884 = vmatpush.msra.mxu1 %v2023_v58 }
 0x299   :  { %907 = vmatpush.msrb.mxu2 %v2202_v3  ;;  %924 = vmatpush.msrb.mxu3 %v2203_v5  ;;  %v2052_v3 = vld [vmem:[#allocation5 + $0x100] sm:$0xff] }
 0x29a   :  { %868 = vmatpush.msra.mxu0 %v2028_v59  ;;  %885 = vmatpush.msra.mxu1 %v2031_v61 }
 0x29b   :  { %908 = vmatpush.msrb.mxu2 %v2220_v6  ;;  %925 = vmatpush.msrb.mxu3 %v2221_v10 }
 0x29c   :  { %869 = vmatpush.msra.mxu0 %v2036_v63  ;;  %886 = vmatpush.msra.mxu1 %v2039_v9 }
 0x29d   :  { %909 = vmatpush.msrb.mxu2 %v2224_v13  ;;  %926 = vmatpush.msrb.mxu3 %v2225_v14  ;;  %v1150_v13 = vld [vmem:[#allocation5 + $0xe8] sm:$0xff] }
 0x29e   :  { %887 = vmatpush.msra.mxu1 %v2044_v27 }
 0x29f   :  { %927 = vmatpush.msrb.mxu3 %v2227_v16  ;;  %v1152_v16 = vld [vmem:[#allocation5 + $0xc8] sm:$0xff] }
 0x2a0   :  { %888 = vmatpush.msra.mxu1 %v2048_v34 }
 0x2a1   :  { %928 = vmatpush.msrb.mxu3 %v2215_v18 }
 0x2a2   :  { %889 = vmatpush.msra.mxu1 %v2052_v3 }
 0x2a3   :  { %929 = vmatpush.msrb.mxu3 %v2217_v36  ;;  %v1149_v36 = vld [vmem:[#allocation5 + $0xf8] sm:$0xff] }
 0x2fa   :  { %v695_v5 = vpop.f32.mrf.mxu0 }
 0x300   :  { %v715_v29 = vpop.f32.mrf.mxu1  ;;  %v735_v44 = vpop.f32.mrf.mxu2 }
 0x301   :  { %v716_v62 = vadd.f32 %v715_v29, %v695_v5 }
 0x303   :  { %v758_v32 = vadd.f32 %v716_v62, %v157_v26  ;;  %v2236_v62 = vld [vmem:[#allocation31_spill] sm:$0xff] }
 0x305   :  { %1101 = vtanh.f32 %v758_v32 }
 0x306   :  { %v755_v6 = vpop.f32.mrf.mxu3 }
 0x307   :  { %v756_v10 = vadd.f32 %v755_v6, %v735_v44 }
 0x309   :  { %v759_v12 = vadd.f32 %v756_v10, %v2232_v11 }
 0x30b   :  { %v1102_v18 = vpop.eup %1101  ;;  %1103 = vtanh.f32 %v759_v12  ;;  %v2237_v12 = vld [vmem:[#allocation39_spill] sm:$0xff] }
 0x30c   :  { %782 = vmatmul.f32.vlgmr.msrb.gmra.mxu0 %v1102_v18  ;;  %822 = vmatmul.f32.vlgmr.msra.gmra.mxu2 %v1102_v18  ;;  %v166_v18 = vadd.f32 %v1707_v23, %v2237_v12 }
 0x30d   :  { %941 = vmatpush.msrb.mxu0 %v1936_v33  ;;  %981 = vmatpush.msra.mxu2 %v1149_v36  ;;  %v1170_v33 = vld [vmem:[#allocation5 + $0x38] sm:$0xff] }
 0x30f   :  { %942 = vmatpush.msrb.mxu0 %v1940_v35  ;;  %982 = vmatpush.msra.mxu2 %v1150_v13  ;;  %v1171_v35 = vld [vmem:[#allocation5 + $0x168] sm:$0xff] }
 0x311   :  { %v1104_v14 = vpop.eup %1103  ;;  %943 = vmatpush.msrb.mxu0 %v1944_v40  ;;  %983 = vmatpush.msra.mxu2 %v1151_v15  ;;  %v1173_v40 = vld [vmem:[#allocation5 + $0x158] sm:$0xff] }
 0x312   :  { %802 = vmatmul.f32.vlgmr.msrb.gmra.mxu1 %v1104_v14  ;;  %842 = vmatmul.f32.vlgmr.msra.gmra.mxu3 %v1104_v14 }
 0x313   :  { %944 = vmatpush.msrb.mxu0 %v1948_v60  ;;  %961 = vmatpush.msrb.mxu1 %v1868_v31  ;;  %v1158_v31 = vld [vmem:[#allocation5 + $0x98] sm:$0xff] }
 0x314   :  { %984 = vmatpush.msra.mxu2 %v1152_v16  ;;  %1001 = vmatpush.msra.mxu3 %v1153_v17  ;;  %v1174_v60 = vld [vmem:[#allocation5 + $0x18] sm:$0xff] }
 0x315   :  { %945 = vmatpush.msrb.mxu0 %v1954_v38  ;;  %962 = vmatpush.msrb.mxu1 %v1874_v0  ;;  %v1160_v0 = vld [vmem:[#allocation5 + $0x88] sm:$0xff]  ;;  %v2238_v17 = vld [vmem:[#allocation12_spill] sm:$0xff] }
 0x316   :  { %985 = vmatpush.msra.mxu2 %v1154_v19  ;;  %1002 = vmatpush.msra.mxu3 %v1155_v20  ;;  %v1175_v38 = vld [vmem:[#allocation5 + $0x148] sm:$0xff] }
 0x317   :  { %946 = vmatpush.msrb.mxu0 %v1960_v42  ;;  %963 = vmatpush.msrb.mxu1 %v1880_v2  ;;  %v1162_v2 = vld [vmem:[#allocation5 + $0x78] sm:$0xff]  ;;  %v1176_v42 = vld [vmem:[#allocation5 + $0x8] sm:$0xff] }
 0x318   :  { %986 = vmatpush.msra.mxu2 %v1156_v21  ;;  %1003 = vmatpush.msra.mxu3 %v1157_v25 }
 0x319   :  { %947 = vmatpush.msrb.mxu0 %v1966_v39  ;;  %964 = vmatpush.msrb.mxu1 %v1886_v4  ;;  %v1164_v4 = vld [vmem:[#allocation5 + $0x68] sm:$0xff]  ;;  %v1177_v39 = vld [vmem:[#allocation5 + $0x138] sm:$0xff] }
 0x31a   :  { %987 = vmatpush.msra.mxu2 %v1158_v31  ;;  %1004 = vmatpush.msra.mxu3 %v1159_v28 }
 0x31b   :  { %948 = vmatpush.msrb.mxu0 %v1972_v43  ;;  %965 = vmatpush.msrb.mxu1 %v1975_v45  ;;  %v1178_v43 = vld [vmem:[#allocation5 + $0x128] sm:$0xff]  ;;  %v1179_v45 = vld [vmem:[#allocation5 + $0x118] sm:$0xff] }
 0x31c   :  { %988 = vmatpush.msra.mxu2 %v1160_v0  ;;  %1005 = vmatpush.msra.mxu3 %v1161_v30 }
 0x31d   :  { %949 = vmatpush.msrb.mxu0 %v1980_v46  ;;  %966 = vmatpush.msrb.mxu1 %v1983_v47  ;;  %v1180_v46 = vld [vmem:[#allocation5 + $0x108] sm:$0xff] }
 0x31e   :  { %989 = vmatpush.msra.mxu2 %v1162_v2  ;;  %1006 = vmatpush.msra.mxu3 %v1163_v41 }
 0x31f   :  { %950 = vmatpush.msrb.mxu0 %v1988_v48  ;;  %967 = vmatpush.msrb.mxu1 %v1991_v49  ;;  %v2233_v49 = vld [vmem:[#allocation37_spill] sm:$0xff] }
 0x320   :  { %990 = vmatpush.msra.mxu2 %v1164_v4  ;;  %1007 = vmatpush.msra.mxu3 %v1165_v51 }
 0x321   :  { %951 = vmatpush.msrb.mxu0 %v1996_v50  ;;  %968 = vmatpush.msrb.mxu1 %v1999_v52  ;;  %v160_v50 = vadd.f32 %v1707_v23, %v2233_v49 }
 0x322   :  { %991 = vmatpush.msra.mxu2 %v1166_v37  ;;  %1008 = vmatpush.msra.mxu3 %v1167_v1 }
 0x323   :  { %952 = vmatpush.msrb.mxu0 %v2004_v53  ;;  %969 = vmatpush.msrb.mxu1 %v2007_v54 }
 0x324   :  { %992 = vmatpush.msra.mxu2 %v1168_v7  ;;  %1009 = vmatpush.msra.mxu3 %v1169_v22 }
 0x325   :  { %953 = vmatpush.msrb.mxu0 %v2012_v55  ;;  %970 = vmatpush.msrb.mxu1 %v2015_v56 }
 0x326   :  { %993 = vmatpush.msra.mxu2 %v1170_v33  ;;  %1010 = vmatpush.msra.mxu3 %v1171_v35 }
 0x327   :  { %954 = vmatpush.msrb.mxu0 %v2020_v57  ;;  %971 = vmatpush.msrb.mxu1 %v2023_v58  ;;  %v2234_v57 = vld [vmem:[#allocation32_spill] sm:$0xff] }
 0x328   :  { %994 = vmatpush.msra.mxu2 %v1172_v8  ;;  %1011 = vmatpush.msra.mxu3 %v1173_v40 }
 0x329   :  { %955 = vmatpush.msrb.mxu0 %v2028_v59  ;;  %972 = vmatpush.msrb.mxu1 %v2031_v61 }
 0x32a   :  { %995 = vmatpush.msra.mxu2 %v1174_v60  ;;  %1012 = vmatpush.msra.mxu3 %v1175_v38 }
 0x32b   :  { %956 = vmatpush.msrb.mxu0 %v2036_v63  ;;  %973 = vmatpush.msrb.mxu1 %v2039_v9 }
 0x32c   :  { %996 = vmatpush.msra.mxu2 %v1176_v42  ;;  %1013 = vmatpush.msra.mxu3 %v1177_v39 }
 0x32d   :  { %974 = vmatpush.msrb.mxu1 %v2044_v27  ;;  %v2235_v27 = vld [vmem:[#allocation38_spill] sm:$0xff] }
 0x32e   :  { %1014 = vmatpush.msra.mxu3 %v1178_v43 }
 0x32f   :  { %975 = vmatpush.msrb.mxu1 %v2048_v34  ;;  %v163_v34 = vadd.f32 %v1707_v23, %v2235_v27 }
 0x330   :  { %1015 = vmatpush.msra.mxu3 %v1179_v45 }
 0x331   :  { %976 = vmatpush.msrb.mxu1 %v2052_v3 }
 0x332   :  { %1016 = vmatpush.msra.mxu3 %v1180_v46 }
 0x389   :  { %v783_v47 = vpop.f32.mrf.mxu0 }
 0x38f   :  { %v803_v48 = vpop.f32.mrf.mxu1  ;;  %v823_v54 = vpop.f32.mrf.mxu2 }
 0x390   :  { %v804_v52 = vadd.f32 %v803_v48, %v783_v47 }
 0x392   :  { %v846_v53 = vadd.f32 %v804_v52, %v160_v50 }
 0x394   :  { %1105 = vtanh.f32 %v846_v53 }
 0x395   :  { %v843_v55 = vpop.f32.mrf.mxu3 }
 0x396   :  { %v844_v56 = vadd.f32 %v843_v55, %v823_v54 }
 0x398   :  { %v847_v58 = vadd.f32 %v844_v56, %v2234_v57 }
 0x39a   :  { %v1106_v59 = vpop.eup %1105  ;;  %1107 = vtanh.f32 %v847_v58 }
 0x39b   :  { %870 = vmatmul.f32.vlgmr.msra.gmra.mxu0 %v1106_v59  ;;  %910 = vmatmul.f32.vlgmr.msrb.gmra.mxu2 %v1106_v59 }
 0x3a0   :  { %v1108_v61 = vpop.eup %1107 }
 0x3a1   :  { %890 = vmatmul.f32.vlgmr.msra.gmra.mxu1 %v1108_v61  ;;  %930 = vmatmul.f32.vlgmr.msrb.gmra.mxu3 %v1108_v61 }
 0x418   :  { %v871_v63 = vpop.f32.mrf.mxu0 }
 0x41e   :  { %v891_v9 = vpop.f32.mrf.mxu1  ;;  %v911_v29 = vpop.f32.mrf.mxu2 }
 0x41f   :  { %v892_v3 = vadd.f32 %v891_v9, %v871_v63 }
 0x421   :  { %v934_v5 = vadd.f32 %v892_v3, %v163_v34 }
 0x423   :  { %1109 = vtanh.f32 %v934_v5 }
 0x424   :  { %v931_v24 = vpop.f32.mrf.mxu3 }
 0x425   :  { %v932_v26 = vadd.f32 %v931_v24, %v911_v29 }
 0x427   :  { %v935_v32 = vadd.f32 %v932_v26, %v2236_v62 }
 0x429   :  { %v1110_v44 = vpop.eup %1109  ;;  %1111 = vtanh.f32 %v935_v32 }
 0x42a   :  { %957 = vmatmul.f32.vlgmr.msrb.gmra.mxu0 %v1110_v44  ;;  %997 = vmatmul.f32.vlgmr.msra.gmra.mxu2 %v1110_v44 }
 0x42f   :  { %v1112_v6 = vpop.eup %1111 }
 0x430   :  { %977 = vmatmul.f32.vlgmr.msrb.gmra.mxu1 %v1112_v6  ;;  %1017 = vmatmul.f32.vlgmr.msra.gmra.mxu3 %v1112_v6 }
 0x4a7   :  { %v958_v10 = vpop.f32.mrf.mxu0 }
 0x4ad   :  { %v978_v11 = vpop.f32.mrf.mxu1  ;;  %v998_v14 = vpop.f32.mrf.mxu2 }
 0x4ae   :  { %v979_v36 = vadd.f32 %v978_v11, %v958_v10 }
 0x4b0   :  { %v1021_v13 = vadd.f32 %v979_v36, %v166_v18 }
 0x4b2   :  { %1113 = vtanh.f32 %v1021_v13 }
 0x4b3   :  { %v1018_v15 = vpop.f32.mrf.mxu3 }
 0x4b4   :  { %v1019_v16 = vadd.f32 %v1018_v15, %v998_v14 }
 0x4b6   :  { %v1022_v19 = vadd.f32 %v1019_v16, %v2238_v17 }
 0x4b8   :  { %v1114_v20 = vpop.eup %1113  ;;  %1115 = vtanh.f32 %v1022_v19 }
 0x4b9   :  { %1030 = vst [vmem:[#allocation8] sm:$0xff] %v1114_v20 }
 0x4be   :  { %v1116_v23 = vpop.eup %1115 }
 0x4bf   :  { %1032 = vst [vmem:[#allocation8 + $0x8] sm:$0xff] %v1116_v23 }
 0x4c0   :  { %1045 = dma.vmem_to_hbm [thread:$0]  %s1038_s3, 256, %s1040_s7, [#allocation7], %s1237_s27, %s1237_s27, %s1238_s28  }
 0x4c1   :  { %1231 = dma.done.wait [#allocation7], 256  }
 0x4c2   :  { %1232 = vsyncadd [#allocation7], 4294967040 }
 0x4c3   :  { %1050 = vsyncpa [#allocation6], 1 }
 0x4c4   :  { %1051 = vsyncpa [#allocation7], 1 }

</bundles_post_ra>
